<compile_context>
chip_gen: v5e
topology: v5e:2x2
jax: 0.10.0
libtpu: 0.0.40
codegen_flags: <defaults>
</compile_context>

<pallas_src>
import functools

import jax
import jax.numpy as jnp
from jax import lax
from jax.experimental import pallas as pl
from jax.experimental.pallas import tpu as pltpu

EPS = 1e-5


def _fused_kernel(x1_ref, x2_ref, w_ref, gb_ref, o_ref, *, inv_m):
    # x1_ref, x2_ref: (Cin, Mp); w_ref: (Ct, Cin); gb_ref: (Ct, 2); o_ref: (Ct, Mp)
    a = jnp.maximum(x1_ref[...] + x2_ref[...], 0.0)          # add + ReLU (VPU)

    # 1x1 conv == per-pixel channel matmul on the MXU: (Ct,Cin) @ (Cin,Mp).
    # Padded lanes of `a` are exact zeros -> padded columns of y are zeros.
    # (bf16 inputs would cut vmatmul count ~3x on v6e but the kernel is
    #  overhead-bound at these shapes; keeping f32 for exactness.)
    y = jnp.dot(w_ref[...], a, preferred_element_type=jnp.float32)   # (Ct, Mp)

    # BatchNorm training-mode statistics in a single pass over y:
    # per-channel mean and biased variance over the real M columns.
    # inv_m is 1/real-M (NOT 1/padded width); zero padded columns add nothing.
    s = jnp.sum(y, axis=-1, keepdims=True)                   # (Ct, 1)
    s2 = jnp.sum(y * y, axis=-1, keepdims=True)              # (Ct, 1)
    mean = s * inv_m
    var = s2 * inv_m - mean * mean                           # biased variance
    inv_std = lax.rsqrt(var + EPS)

    gamma = gb_ref[:, 0:1]                                   # (Ct, 1)
    beta = gb_ref[:, 1:2]                                    # (Ct, 1)
    scale = gamma * inv_std                                  # fold gamma*inv
    shift = beta - mean * scale                              # fold -mean*scale+beta
    o_ref[...] = (y * scale + shift).astype(o_ref.dtype)     # one FMA epilogue


def fused_add_relu_conv1x1_bn(x141, x149, w2d, gb, *, cout_tile=200):
    """x141, x149: (N, C, H, W) f32. w2d: (Cout, Cin) f32. gb: (Cout, 2) = [gamma, beta]."""
    N, C, H, W = x141.shape
    Cout = w2d.shape[0]
    M = N * H * W
    M_pad = ((M + 127) // 128) * 128          # lane-dense last dimension

    # Channels-as-rows layout (C, M). For N == 1 this is a pure reshape of the
    # NCHW buffer -- no transpose ops around the kernel.
    if N == 1:
        x1 = x141.reshape(C, M)
        x2 = x149.reshape(C, M)
    else:
        # TODO(synk): for N > 1 feed an (N*H*W, C) layout (pure reshape of
        # NHWC) and compute a @ W^T instead of materializing this transpose.
        x1 = jnp.moveaxis(x141.reshape(N, C, H * W), 1, 0).reshape(C, M)
        x2 = jnp.moveaxis(x149.reshape(N, C, H * W), 1, 0).reshape(C, M)

    pad = M_pad - M
    if pad:
        x1 = jnp.pad(x1, ((0, 0), (0, pad)))
        x2 = jnp.pad(x2, ((0, 0), (0, pad)))

    if Cout % cout_tile != 0 or cout_tile % 8 != 0:
        cout_tile = Cout
    n_blocks = Cout // cout_tile

    kernel = functools.partial(_fused_kernel, inv_m=1.0 / M)

    out_cm = pl.pallas_call(
        kernel,
        out_shape=jax.ShapeDtypeStruct((Cout, M_pad), jnp.float32),
        grid=(n_blocks,),
        in_specs=[
            pl.BlockSpec((C, M_pad), lambda i: (0, 0)),        # x1 resident
            pl.BlockSpec((C, M_pad), lambda i: (0, 0)),        # x2 resident
            pl.BlockSpec((cout_tile, C), lambda i: (i, 0)),    # weight tile (pipelined)
            pl.BlockSpec((cout_tile, 2), lambda i: (i, 0)),    # gamma/beta tile
        ],
        out_specs=pl.BlockSpec((cout_tile, M_pad), lambda i: (i, 0)),
        compiler_params=pltpu.CompilerParams(
            dimension_semantics=("parallel",)),                # 2 TCs on v7x
    )(x1, x2, w2d, gb)

    out_cm = out_cm[:, :M]                                     # drop lane padding
    if N == 1:
        return out_cm.reshape(1, Cout, H, W)
    return jnp.moveaxis(out_cm.reshape(Cout, N, H, W), 0, 1)


def reference(x141, x149, weight, gamma, beta):
    """Pure-JAX reference for correctness checking."""
    a = jnp.maximum(x141 + x149, 0.0)
    y = jnp.einsum('nchw,oc->nohw', a, weight.reshape(weight.shape[0], -1))
    m = jnp.mean(y, axis=(0, 2, 3), keepdims=True)
    v = jnp.mean((y - m) ** 2, axis=(0, 2, 3), keepdims=True)
    return (y - m) * lax.rsqrt(v + EPS) * gamma.reshape(1, -1, 1, 1) \
        + beta.reshape(1, -1, 1, 1)


if __name__ == "__main__":
    N, C, H, W = 1, 400, 7, 7   # shapes implied by the module
    Cout = 400

    key = jax.random.PRNGKey(0)
    k1, k2, k3 = jax.random.split(key, 3)
    x141 = jax.random.normal(k1, (N, C, H, W), dtype=jnp.float32)
    x149 = jax.random.normal(k2, (N, C, H, W), dtype=jnp.float32)

    # Deterministic parameter init (synthetic, not a checkpoint load).
    weight = jax.random.normal(k3, (Cout, C, 1, 1), dtype=jnp.float32) * 0.05
    gamma = jnp.ones((Cout,), dtype=jnp.float32)   # BatchNorm affine init
    beta = jnp.zeros((Cout,), dtype=jnp.float32)

    # One-time parameter prep (hoisted out of the per-call wrapper).
    # TODO(synk): if called per-layer in a network, keep w2d/gb pinned in VMEM
    # or prefetch them with a cross-pallas_call DMA future.
    w2d = weight.reshape(Cout, C)                  # (Cout, Cin) for W @ x
    gb = jnp.stack([gamma, beta], axis=-1)         # (Cout, 2)

    out = fused_add_relu_conv1x1_bn(x141, x149, w2d, gb)
    out = jax.block_until_ready(out)

    ref = reference(x141, x149, weight, gamma, beta)
    assert out.shape == (N, Cout, H, W)
    assert jnp.allclose(out, ref, atol=1e-3, rtol=1e-3), \
        f"max abs err = {jnp.max(jnp.abs(out - ref))}"

    print("KERNEL_OK")
</pallas_src>

<mosaic_0001>
module attributes {stable_mosaic.version = 11 : i64} {
  func.func @_fused_kernel(%arg0: i32, %arg1: memref<400x128xf32, #tpu.memory_space<vmem>>, %arg2: memref<400x128xf32, #tpu.memory_space<vmem>>, %arg3: memref<200x400xf32, #tpu.memory_space<vmem>>, %arg4: memref<200x2xf32, #tpu.memory_space<vmem>>, %arg5: memref<200x128xf32, #tpu.memory_space<vmem>>) attributes {dimension_semantics = [#tpu.dimension_semantics<parallel>], iteration_bounds = array<i64: 2>, scalar_prefetch = 0 : i64, scratch_operands = 0 : i64, tpu.core_type = #tpu.core_type<tc>, window_params = [{pipeline_mode = #tpu.pipeline_mode<synchronous>, transform_indices = @transform_0, window_bounds = array<i64: 400, 128>}, {pipeline_mode = #tpu.pipeline_mode<synchronous>, transform_indices = @transform_1, window_bounds = array<i64: 400, 128>}, {transform_indices = @transform_2, window_bounds = array<i64: 200, 400>}, {transform_indices = @transform_3, window_bounds = array<i64: 200, 2>}, {transform_indices = @transform_4, window_bounds = array<i64: 200, 128>}]} {
    %c0 = arith.constant 0 : index
    %c0_0 = arith.constant 0 : index
    %0 = vector.load %arg1[%c0, %c0_0] : memref<400x128xf32, #tpu.memory_space<vmem>>, vector<400x128xf32>
    %c0_1 = arith.constant 0 : index
    %c0_2 = arith.constant 0 : index
    %1 = vector.load %arg2[%c0_1, %c0_2] : memref<400x128xf32, #tpu.memory_space<vmem>>, vector<400x128xf32>
    %2 = arith.addf %0, %1 : vector<400x128xf32>
    %cst = arith.constant 0.000000e+00 : f32
    %3 = vector.broadcast %cst : f32 to vector<400x128xf32>
    %4 = arith.maximumf %2, %3 : vector<400x128xf32>
    %c0_3 = arith.constant 0 : index
    %c0_4 = arith.constant 0 : index
    %5 = vector.load %arg3[%c0_3, %c0_4] : memref<200x400xf32, #tpu.memory_space<vmem>>, vector<200x400xf32>
    %cst_5 = arith.constant dense<0.000000e+00> : vector<200x128xf32>
    %6 = tpu.matmul %5, %4, %cst_5 {dimension_numbers = #tpu.dot_dimension_numbers<[1], [0], [0], [1], [0, 0, 1, 1], [], []>} : vector<200x400xf32>, vector<400x128xf32>, vector<200x128xf32> -> vector<200x128xf32>
    %cst_6 = arith.constant dense<0.000000e+00> : vector<200xf32>
    %7 = vector.multi_reduction <add>, %6, %cst_6 [1] : vector<200x128xf32> to vector<200xf32>
    %8 = vector.shape_cast %7 : vector<200xf32> to vector<200x1xf32>
    %9 = arith.mulf %6, %6 : vector<200x128xf32>
    %cst_7 = arith.constant dense<0.000000e+00> : vector<200xf32>
    %10 = vector.multi_reduction <add>, %9, %cst_7 [1] : vector<200x128xf32> to vector<200xf32>
    %11 = vector.shape_cast %10 : vector<200xf32> to vector<200x1xf32>
    %cst_8 = arith.constant 0.0204081628 : f32
    %12 = vector.broadcast %cst_8 : f32 to vector<200x1xf32>
    %13 = arith.mulf %8, %12 : vector<200x1xf32>
    %cst_9 = arith.constant 0.0204081628 : f32
    %14 = vector.broadcast %cst_9 : f32 to vector<200x1xf32>
    %15 = arith.mulf %11, %14 : vector<200x1xf32>
    %16 = arith.mulf %13, %13 : vector<200x1xf32>
    %17 = arith.subf %15, %16 : vector<200x1xf32>
    %cst_10 = arith.constant 9.99999974E-6 : f32
    %18 = vector.broadcast %cst_10 : f32 to vector<200x1xf32>
    %19 = arith.addf %17, %18 : vector<200x1xf32>
    %20 = math.rsqrt %19 : vector<200x1xf32>
    %c0_11 = arith.constant 0 : index
    %c0_12 = arith.constant 0 : index
    %21 = vector.load %arg4[%c0_11, %c0_12] : memref<200x2xf32, #tpu.memory_space<vmem>>, vector<200x1xf32>
    %c0_13 = arith.constant 0 : index
    %c1 = arith.constant 1 : index
    %22 = vector.load %arg4[%c0_13, %c1] : memref<200x2xf32, #tpu.memory_space<vmem>>, vector<200x1xf32>
    %23 = arith.mulf %21, %20 : vector<200x1xf32>
    %24 = arith.mulf %13, %23 : vector<200x1xf32>
    %25 = arith.subf %22, %24 : vector<200x1xf32>
    %26 = vector.broadcast %23 : vector<200x1xf32> to vector<200x128xf32>
    %27 = arith.mulf %6, %26 : vector<200x128xf32>
    %28 = vector.broadcast %25 : vector<200x1xf32> to vector<200x128xf32>
    %29 = arith.addf %27, %28 : vector<200x128xf32>
    %c0_14 = arith.constant 0 : index
    %c0_15 = arith.constant 0 : index
    %30 = vector.load %arg5[%c0_14, %c0_15] : memref<200x128xf32, #tpu.memory_space<vmem>>, vector<200x128xf32>
    tpu.vector_store %arg5[%c0_14, %c0_15], %29 {strides = array<i32>} : memref<200x128xf32, #tpu.memory_space<vmem>>, vector<200x128xf32>,
    return
  }
  func.func @transform_0(%arg0: i32) -> (i32, i32) {
    %c0_i32 = arith.constant 0 : i32
    %c0_i32_0 = arith.constant 0 : i32
    %c0_i32_1 = arith.constant 0 : i32
    return %c0_i32, %c0_i32_0 : i32, i32
  }
  func.func @transform_1(%arg0: i32) -> (i32, i32) {
    %c0_i32 = arith.constant 0 : i32
    %c0_i32_0 = arith.constant 0 : i32
    %c0_i32_1 = arith.constant 0 : i32
    return %c0_i32, %c0_i32_0 : i32, i32
  }
  func.func @transform_2(%arg0: i32) -> (i32, i32) {
    %c0_i32 = arith.constant 0 : i32
    %c0_i32_0 = arith.constant 0 : i32
    return %arg0, %c0_i32 : i32, i32
  }
  func.func @transform_3(%arg0: i32) -> (i32, i32) {
    %c0_i32 = arith.constant 0 : i32
    %c0_i32_0 = arith.constant 0 : i32
    return %arg0, %c0_i32 : i32, i32
  }
  func.func @transform_4(%arg0: i32) -> (i32, i32) {
    %c0_i32 = arith.constant 0 : i32
    %c0_i32_0 = arith.constant 0 : i32
    return %arg0, %c0_i32 : i32, i32
  }
}

</mosaic_0001>

<bundles_post_ra>
// kernel: tpu_custom_call.1
= control target key start
LH: loop header
LB: loop body
LE: loop exit
PB: predicated region body
PF: predicated region fallthrough
CT: control target
= control target key end

     0   :  { %9 = vsyncpa [#allocation3], 0  ;;  %s3767_s0 = inlined_call_operand.vmem [shape: f32[400,128], index: 0, kind: input, shape index: {}]   ;;  %s3768_s1 = inlined_call_operand.hbm [shape: f32[400,128], index: 1, kind: input, shape index: {}]   ;;  %s3769_s2 = inlined_call_operand.hbm [shape: f32[400,400], index: 2, kind: input, shape index: {}]   ;;  %s3770_s3 = inlined_call_operand.vmem [shape: f32[400,2], index: 3, kind: input, shape index: {}]   ;;  %s3771_s4 = inlined_call_operand.hbm [shape: f32[400,128], index: 4, kind: output, shape index: {}]  }
   0x1   :  { %10 = vsyncpa [#allocation6], 0 }
   0x2   :  { %12 = vsyncpa [#allocation6 + $0x1], 0 }
   0x3   :  { %13 = vsyncpa [#allocation4], 0 }
   0x4   :  { %15 = vsyncpa [#allocation4 + $0x1], 0  ;;  %s2492_s15 = smov 0   ;;  %s2494_s16 = smov 0  }
   0x5   :  { %s2496_s17 = smov 0   ;;  %s2498_s18 = smov 0  }
   0x6 LB: > { %s2513_s19 = sadd.s32 4294967295, %s2455_s18   ;;  %s2142_s20 = sadd.s32 4294967294, %s2455_s18   ;;  %s2455_s18 = sphi %s2498_s18, %s3844_s18   ;;  %s2451_s17 = sphi %s2496_s17, %s3843_s17   ;;  %s2447_s16 = sphi %s2494_s16, %s3842_s16   ;;  %s2443_s15 = sphi %s2492_s15, %s3841_s15  }
   0x7   : > { %p83_p0 = scmp.ne.s32.totalorder %s2447_s16, %s2443_s15  ;;  %p84_p1 = scmp.eq.s32.totalorder %s2513_s19, 0 }
   0x8   : > { %p133_p2 = scmp.eq.s32.totalorder %s2513_s19, 1  ;;  %p139_p3 = scmp.eq.s32.totalorder %s2142_s20, 1 }
   0x9   : > { %p2522_p4 = por %p84_p1, %p83_p0  ;;  %p2143_p5 = scmp.ge.s32.totalorder %s2455_s18, 1 }
   0xa   : > { %p2527_p6 = por %p139_p3, %p83_p0  ;;  %p146_p7 = scmp.lt.s32.totalorder %s2455_s18, 3 }
   0xb   : > { %s160_s25 = sshll.u32 %s3768_s1, 4  ;;  %s2457_s27 = smov [#allocation2]   ;;  %s161_s25 = int_to_ptr.hbm [resolvable:$true] %s160_s25 }
   0xc   : > { %p2535_p8 = pnand %p2143_p5, %p146_p7  ;;  %s162_s28 = sshll.u32 %s2457_s27, 4  ;;  %s163_s28 = int_to_ptr.vmem [resolvable:$true] %s162_s28 }
   0xd   : > { %s2545_s29 = sadd.s32 1, %s2455_s18   ;;  %s2458_s30 = smov 128  }
   0xe   : > { %p2194_p9 = pneg %p2535_p8  ;;  %s2459_s5 = smov 8  }
   0xf   : > { %s67_s6 = ssub.s32 %s2455_s18, %s2545_s29  ;;  %s70_s7 = sadd.s32 1, %s2451_s17 }
  0x10   : > { %p2195_p10 = pnand %p2194_p9, %p84_p1  ;;  %p68_p12 = scmp.eq.s32.totalorder %s67_s6, 0 }
  0x11   : > { %p77_p13 = scmp.ne.s32.totalorder %s2451_s17, %s2447_s16  ;;  %p78_p0 = scmp.eq.s32.totalorder %s2455_s18, 0 }
  0x12   : > { %2197 = dma.hbm_to_vmem [thread:$0]  (!%p2195_p10), %s161_s25, 6400, %s163_s28, [#allocation3], %s2458_s30, %s2458_s30, %s2459_s5  }
  0x13   : > { %p2207_p3 = scmp.lt.s32.totalorder %s2455_s18, 2  ;;  %p79_p5 = por %p78_p0, %p77_p13 }
  0x14   : > { %s2555_s8 = scalar_select %p68_p12, %s2451_s17, %s70_s7  }
  0x15   : > { %p2559_p7 = por %p133_p2, %p77_p13  ;;  %s176_s10 = sand.u32 1, %s2451_s17  }
  0x16   : > { %s2182_s11 = smul.u32 800, %s2455_s18  ;;  %p2568_p9 = pnand %p2207_p3, %p79_p5 }
  0x17   : > { %s2183_s12 = smul.u32 800, %s176_s10  ;;  %s177_s28 = scalar_lea.sflag [#allocation6], %s176_s10 }
  0x18   : > { %s186_s20 = scalar_lea.hbm %s3769_s2, %s2182_s11  ;;  %p2359_p10 = pneg %p2568_p9 }
  0x19   : > { %s187_s24 = sshll.u32 %s186_s20, 4  ;;  %s180_s25 = scalar_lea.vmem [#allocation5], %s2183_s12  ;;  %s188_s24 = int_to_ptr.hbm [resolvable:$true] %s187_s24 }
  0x1a   : > { %s189_s27 = sshll.u32 %s180_s25, 4  ;;  %s2355_s30 = sshra.s32 %s188_s24, 4  ;;  %s190_s27 = int_to_ptr.vmem [resolvable:$true] %s189_s27  ;;  %s2356_s30 = int_to_ptr.hbm [resolvable:$true] %s2355_s30 }
  0x1b   : > { %s2357_s5 = scalar_lea.hbm %s2356_s30, 800  ;;  %s2362_s11 = scalar_lea.hbm %s3769_s2, 1600 }
  0x1c   : > { %p2358_p2 = scmp.ne.s32.totalorder %s2356_s30, %s2357_s5  ;;  %p2363_p0 = scmp.lt.s32.totalorder %s2356_s30, %s3769_s2 }
  0x1d   : > { %p2364_p3 = scmp.lt.s32.totalorder %s2362_s11, %s2357_s5 }
  0x1e   : > { %p2360_p12 = pnand %p2359_p10, %p2358_p2 }
  0x1f   : > { %p2365_p5 = por %p2364_p3, %p2363_p0 }
  0x20   : > { %p2361_p13 = pneg %p2360_p12 }
  0x22   : > { %p2366_p11 = pnand %p2365_p5, %p2361_p13 }
  0x24   : > { %2369 = shalt.err (!%p2366_p11)
}
  0x25   : > { %s2460_s10 = smov 512   ;;  %s2461_s12 = smov 32  }
  0x26   : > { %2201 = dma.hbm_to_vmem [thread:$0]  (!%p2568_p9), %s188_s24, 12800, %s190_s27, %s177_s28, %s2460_s10, %s2460_s10, %s2461_s12  }
  0x27   : > { %210 = sbr.rel (%p2535_p8) target bundleno = 914 (0x392), region = 36 }
  0x2c   : > { %2430 = dma.done.wait (%p84_p1), [#allocation3], 6400  }
  0x2d   : > { %2432 = vsyncadd (%p84_p1), [#allocation3], 4294960896  ;;  %s2589_s20 = sand.u32 1, %s2447_s16  }
  0x2e   : > { %s2184_s25 = smul.u32 800, %s2589_s20  ;;  %s218_s30 = scalar_lea.sflag [#allocation6], %s2589_s20 }
  0x30   : > { %s2593_s5 = scalar_lea.vmem [#allocation5], %s2184_s25 }
  0x31   : > { %2434 = dma.done.wait (%p2522_p4), %s218_s30, 12800  }
  0x32   : > { %2436 = vsyncadd (%p2522_p4), %s218_s30, 4294954496  ;;  %v307_v0 = vld [vmem:[%s3767_s0 + $0x178] sm:$0xff]  ;;  %v306_v2 = vld [vmem:[%s3767_s0 + $0x170] sm:$0xff]  ;;  %vm560_vm0 = vcmask 130048   ;;  %s253_s14 = smul.u32 25, %s2513_s19  ;;  %s2463_s30 = smov 1  }
  0x33   : > { %v357_v1 = vld [vmem:[#allocation2 + $0x178] sm:$0xff]  ;;  %v356_v4 = vld [vmem:[#allocation2 + $0x170] sm:$0xff]  ;;  %v305_v11 = vld [vmem:[%s3767_s0 + $0x168] sm:$0xff]  ;;  %s2185_s26 = smul.u32 200, %s2589_s20  ;;  %s2030_s11 = scalar_lea.sflag [#allocation4], %s2589_s20 }
  0x34   : > { %v407_v3 = vadd.f32 %v357_v1, %v307_v0  ;;  %v275_v5 = vld [vmem:[%s3767_s0 + $0x78] sm:$0xff]  ;;  %v406_v7 = vadd.f32 %v356_v4, %v306_v2  ;;  %v355_v14 = vld [vmem:[#allocation2 + $0x168] sm:$0xff]  ;;  %v274_v15 = vld [vmem:[%s3767_s0 + $0x70] sm:$0xff]  ;;  %p254_p1 = scmp.lt.s32.totalorder %s253_s14, 49  ;;  %s2181_s24 = smul.u32 200, %s2513_s19 }
  0x35   : > { %v325_v6 = vld [vmem:[#allocation2 + $0x78] sm:$0xff]  ;;  %v324_v16 = vld [vmem:[#allocation2 + $0x70] sm:$0xff]  ;;  %v405_v19 = vadd.f32 %v355_v14, %v305_v11  ;;  %v304_v23 = vld [vmem:[%s3767_s0 + $0x160] sm:$0xff]  ;;  %s3641_s23 = scalar_lea.vmem [#allocation7], %s2185_s26  ;;  %s2405_s10 = scalar_lea.hbm %s3771_s4, 400 }
  0x36   : > { %v375_v8 = vadd.f32 %v325_v6, %v275_v5  ;;  %v291_v9 = vld [vmem:[%s3767_s0 + $0xf8] sm:$0xff]  ;;  %v457_v12 = vmax.f32 %v407_v3, 0.0  ;;  %v456_v17 = vmax.f32 %v406_v7, 0.0  ;;  %v374_v20 = vadd.f32 %v324_v16, %v274_v15  ;;  %v290_v21 = vld [vmem:[%s3767_s0 + $0xf0] sm:$0xff]  ;;  %v354_v26 = vld [vmem:[#allocation2 + $0x160] sm:$0xff]  ;;  %s3846_s14 = smov (!%p254_p1, %s253_s14), 49  ;;  %s2041_s6 = scalar_lea.hbm %s3771_s4, %s2181_s24 }
  0x37   : > { %v341_v10 = vld [vmem:[#allocation2 + $0xf8] sm:$0xff]  ;;  %v340_v22 = vld [vmem:[#allocation2 + $0xf0] sm:$0xff]  ;;  %v273_v27 = vld [vmem:[%s3767_s0 + $0x68] sm:$0xff]  ;;  %v455_v29 = vmax.f32 %v405_v19, 0.0  ;;  %v404_v31 = vadd.f32 %v354_v26, %v304_v23  ;;  %s2042_s21 = sshll.u32 %s3641_s23, 4  ;;  %s2044_s7 = sshll.u32 %s2041_s6, 4  ;;  %s2043_s21 = int_to_ptr.vmem [resolvable:$true] %s2042_s21  ;;  %s2045_s7 = int_to_ptr.hbm [resolvable:$true] %s2044_s7 }
  0x38   : > { %v391_v13 = vadd.f32 %v341_v10, %v291_v9  ;;  %v425_v18 = vmax.f32 %v375_v8, 0.0  ;;  %820 = vmatpush.msra.mxu2 %v457_v12  ;;  %v390_v25 = vadd.f32 %v340_v22, %v290_v21  ;;  %v323_v28 = vld [vmem:[#allocation2 + $0x68] sm:$0xff]  ;;  %v424_v30 = vmax.f32 %v374_v20, 0.0  ;;  %v303_v35 = vld [vmem:[%s3767_s0 + $0x158] sm:$0xff]  ;;  %v272_v39 = vld [vmem:[%s3767_s0 + $0x60] sm:$0xff]  ;;  %s2399_s13 = sshra.s32 %s2045_s7, 4  ;;  %s2400_s13 = int_to_ptr.hbm [resolvable:$true] %s2399_s13 }
  0x39   : > { %v373_v32 = vadd.f32 %v323_v28, %v273_v27  ;;  %v289_v33 = vld [vmem:[%s3767_s0 + $0xe8] sm:$0xff]  ;;  %v353_v38 = vld [vmem:[#allocation2 + $0x158] sm:$0xff]  ;;  %v322_v40 = vld [vmem:[#allocation2 + $0x60] sm:$0xff]  ;;  %v454_v41 = vmax.f32 %v404_v31, 0.0  ;;  %p2406_p9 = scmp.lt.s32.totalorder %s2400_s13, %s3771_s4 }
  0x3a   : > { %v441_v24 = vmax.f32 %v391_v13, 0.0  ;;  %636 = vmatpush.msra.mxu0 %v425_v18  ;;  %v339_v34 = vld [vmem:[#allocation2 + $0xe8] sm:$0xff]  ;;  %821 = vmatpush.msra.mxu2 %v456_v17  ;;  %v440_v36 = vmax.f32 %v390_v25, 0.0  ;;  %v403_v43 = vadd.f32 %v353_v38, %v303_v35  ;;  %v372_v44 = vadd.f32 %v322_v40, %v272_v39  ;;  %v288_v45 = vld [vmem:[%s3767_s0 + $0xe0] sm:$0xff]  ;;  %v302_v47 = vld [vmem:[%s3767_s0 + $0x150] sm:$0xff] }
  0x3b   : > { %v389_v37 = vadd.f32 %v339_v34, %v289_v33  ;;  %v423_v42 = vmax.f32 %v373_v32, 0.0  ;;  %v338_v46 = vld [vmem:[#allocation2 + $0xe0] sm:$0xff]  ;;  %v352_v50 = vld [vmem:[#allocation2 + $0x150] sm:$0xff]  ;;  %v271_v51 = vld [vmem:[%s3767_s0 + $0x58] sm:$0xff] }
  0x3c   : > { %728 = vmatpush.msra.mxu1 %v441_v24  ;;  %637 = vmatpush.msra.mxu0 %v424_v30  ;;  %v388_v49 = vadd.f32 %v338_v46, %v288_v45  ;;  %v321_v52 = vld [vmem:[#allocation2 + $0x58] sm:$0xff]  ;;  %v453_v53 = vmax.f32 %v403_v43, 0.0  ;;  %v422_v54 = vmax.f32 %v372_v44, 0.0  ;;  %v402_v55 = vadd.f32 %v352_v50, %v302_v47  ;;  %v301_v59 = vld [vmem:[%s3767_s0 + $0x148] sm:$0xff]  ;;  %v270_v63 = vld [vmem:[%s3767_s0 + $0x50] sm:$0xff] }
  0x3d   : > { %822 = vmatpush.msra.mxu2 %v455_v29  ;;  %v439_v48 = vmax.f32 %v389_v37, 0.0  ;;  %v371_v56 = vadd.f32 %v321_v52, %v271_v51  ;;  %v287_v57 = vld [vmem:[%s3767_s0 + $0xd8] sm:$0xff]  ;;  %v351_v62 = vld [vmem:[#allocation2 + $0x148] sm:$0xff]  ;;  %v320_v0 = vld [vmem:[#allocation2 + $0x50] sm:$0xff] }
  0x3e   : > { %729 = vmatpush.msra.mxu1 %v440_v36  ;;  %638 = vmatpush.msra.mxu0 %v423_v42  ;;  %v337_v58 = vld [vmem:[#allocation2 + $0xd8] sm:$0xff]  ;;  %v438_v60 = vmax.f32 %v388_v49, 0.0  ;;  %v452_v1 = vmax.f32 %v402_v55, 0.0  ;;  %v401_v3 = vadd.f32 %v351_v62, %v301_v59  ;;  %v370_v4 = vadd.f32 %v320_v0, %v270_v63  ;;  %v286_v5 = vld [vmem:[%s3767_s0 + $0xd0] sm:$0xff]  ;;  %v300_v7 = vld [vmem:[%s3767_s0 + $0x140] sm:$0xff] }
  0x3f   : > { %823 = vmatpush.msra.mxu2 %v454_v41  ;;  %v387_v61 = vadd.f32 %v337_v58, %v287_v57  ;;  %v421_v2 = vmax.f32 %v371_v56, 0.0  ;;  %v336_v6 = vld [vmem:[#allocation2 + $0xd0] sm:$0xff]  ;;  %v350_v10 = vld [vmem:[#allocation2 + $0x140] sm:$0xff]  ;;  %v269_v11 = vld [vmem:[%s3767_s0 + $0x48] sm:$0xff] }
  0x40   : > { %730 = vmatpush.msra.mxu1 %v439_v48  ;;  %639 = vmatpush.msra.mxu0 %v422_v54  ;;  %v386_v9 = vadd.f32 %v336_v6, %v286_v5  ;;  %v319_v12 = vld [vmem:[#allocation2 + $0x48] sm:$0xff]  ;;  %v451_v13 = vmax.f32 %v401_v3, 0.0  ;;  %v420_v14 = vmax.f32 %v370_v4, 0.0  ;;  %v400_v15 = vadd.f32 %v350_v10, %v300_v7  ;;  %v299_v19 = vld [vmem:[%s3767_s0 + $0x138] sm:$0xff]  ;;  %v268_v23 = vld [vmem:[%s3767_s0 + $0x40] sm:$0xff] }
  0x41   : > { %824 = vmatpush.msra.mxu2 %v453_v53  ;;  %v437_v8 = vmax.f32 %v387_v61, 0.0  ;;  %v369_v16 = vadd.f32 %v319_v12, %v269_v11  ;;  %v285_v17 = vld [vmem:[%s3767_s0 + $0xc8] sm:$0xff]  ;;  %v349_v22 = vld [vmem:[#allocation2 + $0x138] sm:$0xff]  ;;  %v318_v24 = vld [vmem:[#allocation2 + $0x40] sm:$0xff] }
  0x42   : > { %731 = vmatpush.msra.mxu1 %v438_v60  ;;  %640 = vmatpush.msra.mxu0 %v421_v2  ;;  %v335_v18 = vld [vmem:[#allocation2 + $0xc8] sm:$0xff]  ;;  %v436_v20 = vmax.f32 %v386_v9, 0.0  ;;  %v450_v25 = vmax.f32 %v400_v15, 0.0  ;;  %v399_v27 = vadd.f32 %v349_v22, %v299_v19  ;;  %v368_v28 = vadd.f32 %v318_v24, %v268_v23  ;;  %v284_v29 = vld [vmem:[%s3767_s0 + $0xc0] sm:$0xff]  ;;  %v298_v31 = vld [vmem:[%s3767_s0 + $0x130] sm:$0xff] }
  0x43   : > { %825 = vmatpush.msra.mxu2 %v452_v1  ;;  %v385_v21 = vadd.f32 %v335_v18, %v285_v17  ;;  %v419_v26 = vmax.f32 %v369_v16, 0.0  ;;  %v334_v30 = vld [vmem:[#allocation2 + $0xc0] sm:$0xff]  ;;  %v348_v34 = vld [vmem:[#allocation2 + $0x130] sm:$0xff]  ;;  %v267_v35 = vld [vmem:[%s3767_s0 + $0x38] sm:$0xff] }
  0x44   : > { %732 = vmatpush.msra.mxu1 %v437_v8  ;;  %641 = vmatpush.msra.mxu0 %v420_v14  ;;  %v384_v33 = vadd.f32 %v334_v30, %v284_v29  ;;  %v317_v36 = vld [vmem:[#allocation2 + $0x38] sm:$0xff]  ;;  %v449_v37 = vmax.f32 %v399_v27, 0.0  ;;  %v418_v38 = vmax.f32 %v368_v28, 0.0  ;;  %v398_v39 = vadd.f32 %v348_v34, %v298_v31  ;;  %v297_v43 = vld [vmem:[%s3767_s0 + $0x128] sm:$0xff]  ;;  %v266_v47 = vld [vmem:[%s3767_s0 + $0x30] sm:$0xff] }
  0x45   : > { %826 = vmatpush.msra.mxu2 %v451_v13  ;;  %v435_v32 = vmax.f32 %v385_v21, 0.0  ;;  %v367_v40 = vadd.f32 %v317_v36, %v267_v35  ;;  %v283_v41 = vld [vmem:[%s3767_s0 + $0xb8] sm:$0xff]  ;;  %v347_v46 = vld [vmem:[#allocation2 + $0x128] sm:$0xff]  ;;  %v316_v48 = vld [vmem:[#allocation2 + $0x30] sm:$0xff] }
  0x46   : > { %733 = vmatpush.msra.mxu1 %v436_v20  ;;  %642 = vmatpush.msra.mxu0 %v419_v26  ;;  %v333_v42 = vld [vmem:[#allocation2 + $0xb8] sm:$0xff]  ;;  %v434_v44 = vmax.f32 %v384_v33, 0.0  ;;  %v448_v49 = vmax.f32 %v398_v39, 0.0  ;;  %v397_v51 = vadd.f32 %v347_v46, %v297_v43  ;;  %v366_v52 = vadd.f32 %v316_v48, %v266_v47  ;;  %v282_v53 = vld [vmem:[%s3767_s0 + $0xb0] sm:$0xff]  ;;  %v296_v55 = vld [vmem:[%s3767_s0 + $0x120] sm:$0xff] }
  0x47   : > { %827 = vmatpush.msra.mxu2 %v450_v25  ;;  %v383_v45 = vadd.f32 %v333_v42, %v283_v41  ;;  %v417_v50 = vmax.f32 %v367_v40, 0.0  ;;  %v332_v54 = vld [vmem:[#allocation2 + $0xb0] sm:$0xff]  ;;  %v346_v58 = vld [vmem:[#allocation2 + $0x120] sm:$0xff]  ;;  %v265_v59 = vld [vmem:[%s3767_s0 + $0x28] sm:$0xff] }
  0x48   : > { %734 = vmatpush.msra.mxu1 %v435_v32  ;;  %643 = vmatpush.msra.mxu0 %v418_v38  ;;  %v382_v57 = vadd.f32 %v332_v54, %v282_v53  ;;  %v315_v60 = vld [vmem:[#allocation2 + $0x28] sm:$0xff]  ;;  %v447_v61 = vmax.f32 %v397_v51, 0.0  ;;  %v416_v62 = vmax.f32 %v366_v52, 0.0  ;;  %v396_v63 = vadd.f32 %v346_v58, %v296_v55  ;;  %v295_v3 = vld [vmem:[%s3767_s0 + $0x118] sm:$0xff]  ;;  %v264_v7 = vld [vmem:[%s3767_s0 + $0x20] sm:$0xff] }
  0x49   : > { %828 = vmatpush.msra.mxu2 %v449_v37  ;;  %v433_v56 = vmax.f32 %v383_v45, 0.0  ;;  %v365_v0 = vadd.f32 %v315_v60, %v265_v59  ;;  %v281_v1 = vld [vmem:[%s3767_s0 + $0xa8] sm:$0xff]  ;;  %v345_v6 = vld [vmem:[#allocation2 + $0x118] sm:$0xff]  ;;  %v314_v8 = vld [vmem:[#allocation2 + $0x20] sm:$0xff] }
  0x4a   : > { %735 = vmatpush.msra.mxu1 %v434_v44  ;;  %644 = vmatpush.msra.mxu0 %v417_v50  ;;  %v331_v2 = vld [vmem:[#allocation2 + $0xa8] sm:$0xff]  ;;  %v432_v4 = vmax.f32 %v382_v57, 0.0  ;;  %v446_v9 = vmax.f32 %v396_v63, 0.0  ;;  %v395_v11 = vadd.f32 %v345_v6, %v295_v3  ;;  %v364_v12 = vadd.f32 %v314_v8, %v264_v7  ;;  %v280_v13 = vld [vmem:[%s3767_s0 + $0xa0] sm:$0xff]  ;;  %v294_v15 = vld [vmem:[%s3767_s0 + $0x110] sm:$0xff] }
  0x4b   : > { %829 = vmatpush.msra.mxu2 %v448_v49  ;;  %v381_v5 = vadd.f32 %v331_v2, %v281_v1  ;;  %v415_v10 = vmax.f32 %v365_v0, 0.0  ;;  %v330_v14 = vld [vmem:[#allocation2 + $0xa0] sm:$0xff]  ;;  %v344_v18 = vld [vmem:[#allocation2 + $0x110] sm:$0xff]  ;;  %v263_v19 = vld [vmem:[%s3767_s0 + $0x18] sm:$0xff] }
  0x4c   : > { %736 = vmatpush.msra.mxu1 %v433_v56  ;;  %645 = vmatpush.msra.mxu0 %v416_v62  ;;  %v380_v17 = vadd.f32 %v330_v14, %v280_v13  ;;  %v313_v20 = vld [vmem:[#allocation2 + $0x18] sm:$0xff]  ;;  %v445_v21 = vmax.f32 %v395_v11, 0.0  ;;  %v414_v22 = vmax.f32 %v364_v12, 0.0  ;;  %v394_v23 = vadd.f32 %v344_v18, %v294_v15  ;;  %v293_v27 = vld [vmem:[%s3767_s0 + $0x108] sm:$0xff]  ;;  %v262_v31 = vld [vmem:[%s3767_s0 + $0x10] sm:$0xff] }
  0x4d   : > { %830 = vmatpush.msra.mxu2 %v447_v61  ;;  %v431_v16 = vmax.f32 %v381_v5, 0.0  ;;  %v363_v24 = vadd.f32 %v313_v20, %v263_v19  ;;  %v279_v25 = vld [vmem:[%s3767_s0 + $0x98] sm:$0xff]  ;;  %v343_v30 = vld [vmem:[#allocation2 + $0x108] sm:$0xff]  ;;  %v312_v32 = vld [vmem:[#allocation2 + $0x10] sm:$0xff] }
  0x4e   : > { %737 = vmatpush.msra.mxu1 %v432_v4  ;;  %646 = vmatpush.msra.mxu0 %v415_v10  ;;  %v329_v26 = vld [vmem:[#allocation2 + $0x98] sm:$0xff]  ;;  %v430_v28 = vmax.f32 %v380_v17, 0.0  ;;  %v444_v33 = vmax.f32 %v394_v23, 0.0  ;;  %v393_v35 = vadd.f32 %v343_v30, %v293_v27  ;;  %v362_v36 = vadd.f32 %v312_v32, %v262_v31  ;;  %v278_v37 = vld [vmem:[%s3767_s0 + $0x90] sm:$0xff]  ;;  %v292_v39 = vld [vmem:[%s3767_s0 + $0x100] sm:$0xff] }
  0x4f   : > { %831 = vmatpush.msra.mxu2 %v446_v9  ;;  %v379_v29 = vadd.f32 %v329_v26, %v279_v25  ;;  %v413_v34 = vmax.f32 %v363_v24, 0.0  ;;  %v328_v38 = vld [vmem:[#allocation2 + $0x90] sm:$0xff]  ;;  %v342_v42 = vld [vmem:[#allocation2 + $0x100] sm:$0xff]  ;;  %v309_v43 = vld [vmem:[%s3767_s0 + $0x188] sm:$0xff] }
  0x50   : > { %738 = vmatpush.msra.mxu1 %v431_v16  ;;  %647 = vmatpush.msra.mxu0 %v414_v22  ;;  %v378_v41 = vadd.f32 %v328_v38, %v278_v37  ;;  %v359_v44 = vld [vmem:[#allocation2 + $0x188] sm:$0xff]  ;;  %v443_v45 = vmax.f32 %v393_v35, 0.0  ;;  %v412_v46 = vmax.f32 %v362_v36, 0.0  ;;  %v392_v47 = vadd.f32 %v342_v42, %v292_v39  ;;  %v308_v55 = vld [vmem:[%s3767_s0 + $0x180] sm:$0xff]  ;;  %v460_v10 = vld [vmem:[%s2593_s5] sm:$0xff] }
  0x51   : > { %832 = vmatpush.msra.mxu2 %v445_v21  ;;  %v429_v40 = vmax.f32 %v379_v29, 0.0  ;;  %v409_v48 = vadd.f32 %v359_v44, %v309_v43  ;;  %v261_v49 = vld [vmem:[%s3767_s0 + $0x8] sm:$0xff]  ;;  %v462_v58 = vld [vmem:[%s2593_s5 + $0x10] sm:$0xff]  ;;  %v461_v11 = vld [vmem:[%s2593_s5 + $0x8] sm:$0xff] }
  0x52   : > { %739 = vmatpush.msra.mxu1 %v430_v28  ;;  %648 = vmatpush.msra.mxu0 %v413_v34  ;;  %v311_v50 = vld [vmem:[#allocation2 + $0x8] sm:$0xff]  ;;  %v428_v51 = vmax.f32 %v378_v41, 0.0  ;;  %v442_v56 = vmax.f32 %v392_v47, 0.0  ;;  %v358_v60 = vld [vmem:[#allocation2 + $0x180] sm:$0xff]  ;;  %v464_v14 = vld [vmem:[%s2593_s5 + $0x20] sm:$0xff] }
  0x53   : > { %833 = vmatpush.msra.mxu2 %v444_v33  ;;  %v361_v52 = vadd.f32 %v311_v50, %v261_v49  ;;  %v277_v53 = vld [vmem:[%s3767_s0 + $0x88] sm:$0xff]  ;;  %v459_v57 = vmax.f32 %v409_v48, 0.0  ;;  %v260_v61 = vld [vmem:[%s3767_s0] sm:$0xff]  ;;  %v408_v63 = vadd.f32 %v358_v60, %v308_v55  ;;  %v465_v15 = vld [vmem:[%s2593_s5 + $0x28] sm:$0xff] }
  0x54   : > { %740 = vmatpush.msra.mxu1 %v429_v40  ;;  %v327_v54 = vld [vmem:[#allocation2 + $0x88] sm:$0xff]  ;;  %649 = vmatpush.msra.mxu0 %v412_v46  ;;  %v310_v0 = vld [vmem:[#allocation2] sm:$0xff]  ;;  %v468_v18 = vld [vmem:[%s2593_s5 + $0x40] sm:$0xff] }
  0x55   : > { %v377_v59 = vadd.f32 %v327_v54, %v277_v53  ;;  %834 = vmatpush.msra.mxu2 %v443_v45  ;;  %v411_v62 = vmax.f32 %v361_v52, 0.0  ;;  %v276_v1 = vld [vmem:[%s3767_s0 + $0x80] sm:$0xff]  ;;  %926 = vmatpush.msra.mxu3 %v459_v57  ;;  %v360_v4 = vadd.f32 %v310_v0, %v260_v61  ;;  %v458_v6 = vmax.f32 %v408_v63, 0.0  ;;  %v463_v7 = vld [vmem:[%s2593_s5 + $0x18] sm:$0xff]  ;;  %v469_v19 = vld [vmem:[%s2593_s5 + $0x48] sm:$0xff] }
  0x56   : > { %741 = vmatpush.msra.mxu1 %v428_v51  ;;  %v326_v2 = vld [vmem:[#allocation2 + $0x80] sm:$0xff]  ;;  %v467_v13 = vld [vmem:[%s2593_s5 + $0x38] sm:$0xff]  ;;  %v472_v22 = vld [vmem:[%s2593_s5 + $0x60] sm:$0xff] }
  0x57   : > { %v427_v3 = vmax.f32 %v377_v59, 0.0  ;;  %v376_v5 = vadd.f32 %v326_v2, %v276_v1  ;;  %835 = vmatpush.msra.mxu2 %v442_v56  ;;  %650 = vmatpush.msra.mxu0 %v411_v62  ;;  %v410_v8 = vmax.f32 %v360_v4, 0.0  ;;  %v466_v12 = vld [vmem:[%s2593_s5 + $0x30] sm:$0xff]  ;;  %v471_v17 = vld [vmem:[%s2593_s5 + $0x58] sm:$0xff]  ;;  %v473_v23 = vld [vmem:[%s2593_s5 + $0x68] sm:$0xff] }
  0x58   : > { %836 = vmatmul.f32.vlgmr.msra.gmra.mxu2 %v462_v58  ;;  %927 = vmatpush.msra.mxu3 %v458_v6  ;;  %v470_v16 = vld [vmem:[%s2593_s5 + $0x50] sm:$0xff]  ;;  %v475_v21 = vld [vmem:[%s2593_s5 + $0x78] sm:$0xff]  ;;  %v476_v26 = vld [vmem:[%s2593_s5 + $0x80] sm:$0xff] }
  0x59   : > { %742 = vmatpush.msra.mxu1 %v427_v3  ;;  %v426_v9 = vmax.f32 %v376_v5, 0.0  ;;  %2151 = vmatmul.msk.f32.vlgmr.msra.gmra.mxu3 %vm560_vm0, %v463_v7  ;;  %v474_v20 = vld [vmem:[%s2593_s5 + $0x70] sm:$0xff]  ;;  %v479_v25 = vld [vmem:[%s2593_s5 + $0x98] sm:$0xff]  ;;  %v477_v27 = vld [vmem:[%s2593_s5 + $0x88] sm:$0xff] }
  0x5a   : > { %651 = vmatpush.msra.mxu0 %v410_v8  ;;  %v478_v24 = vld [vmem:[%s2593_s5 + $0x90] sm:$0xff]  ;;  %v483_v29 = vld [vmem:[%s2593_s5 + $0xb8] sm:$0xff]  ;;  %v480_v30 = vld [vmem:[%s2593_s5 + $0xa0] sm:$0xff] }
  0x5b   : > { %743 = vmatpush.msra.mxu1 %v426_v9  ;;  %652 = vmatmul.f32.vlgmr.msra.gmra.mxu0 %v460_v10  ;;  %v482_v28 = vld [vmem:[%s2593_s5 + $0xb0] sm:$0xff]  ;;  %v481_v31 = vld [vmem:[%s2593_s5 + $0xa8] sm:$0xff]  ;;  %v487_v33 = vld [vmem:[%s2593_s5 + $0xd8] sm:$0xff] }
  0x5c   : > { %744 = vmatmul.f32.vlgmr.msra.gmra.mxu1 %v461_v11  ;;  %v486_v32 = vld [vmem:[%s2593_s5 + $0xd0] sm:$0xff]  ;;  %v484_v34 = vld [vmem:[%s2593_s5 + $0xc0] sm:$0xff]  ;;  %v485_v35 = vld [vmem:[%s2593_s5 + $0xc8] sm:$0xff] }
  0x5d   : > { %v490_v36 = vld [vmem:[%s2593_s5 + $0xf0] sm:$0xff]  ;;  %v491_v37 = vld [vmem:[%s2593_s5 + $0xf8] sm:$0xff]  ;;  %v488_v38 = vld [vmem:[%s2593_s5 + $0xe0] sm:$0xff] }
  0x5e   : > { %v489_v39 = vld [vmem:[%s2593_s5 + $0xe8] sm:$0xff]  ;;  %v494_v40 = vld [vmem:[%s2593_s5 + $0x110] sm:$0xff]  ;;  %v495_v41 = vld [vmem:[%s2593_s5 + $0x118] sm:$0xff] }
  0x5f   : > { %v492_v42 = vld [vmem:[%s2593_s5 + $0x100] sm:$0xff]  ;;  %v493_v43 = vld [vmem:[%s2593_s5 + $0x108] sm:$0xff]  ;;  %v498_v44 = vld [vmem:[%s2593_s5 + $0x130] sm:$0xff] }
  0x60   : > { %839 = vmatmul.f32.gmra.mxu2 %v466_v12  ;;  %v499_v45 = vld [vmem:[%s2593_s5 + $0x138] sm:$0xff]  ;;  %v496_v46 = vld [vmem:[%s2593_s5 + $0x120] sm:$0xff]  ;;  %v497_v47 = vld [vmem:[%s2593_s5 + $0x128] sm:$0xff] }
  0x61   : > { %2152 = vmatmul.msk.f32.gmra.mxu3 %vm560_vm0, %v467_v13  ;;  %v502_v48 = vld [vmem:[%s2593_s5 + $0x150] sm:$0xff]  ;;  %v503_v49 = vld [vmem:[%s2593_s5 + $0x158] sm:$0xff]  ;;  %v500_v50 = vld [vmem:[%s2593_s5 + $0x140] sm:$0xff] }
  0x62   : > { %v501_v51 = vld [vmem:[%s2593_s5 + $0x148] sm:$0xff]  ;;  %v506_v52 = vld [vmem:[%s2593_s5 + $0x170] sm:$0xff]  ;;  %v507_v53 = vld [vmem:[%s2593_s5 + $0x178] sm:$0xff] }
  0x63   : > { %655 = vmatmul.f32.gmra.mxu0 %v464_v14  ;;  %v504_v54 = vld [vmem:[%s2593_s5 + $0x160] sm:$0xff]  ;;  %v505_v55 = vld [vmem:[%s2593_s5 + $0x168] sm:$0xff]  ;;  %v510_v56 = vld [vmem:[%s2593_s5 + $0x190] sm:$0xff] }
  0x64   : > { %747 = vmatmul.f32.gmra.mxu1 %v465_v15  ;;  %v511_v57 = vld [vmem:[%s2593_s5 + $0x198] sm:$0xff]  ;;  %v508_v58 = vld [vmem:[%s2593_s5 + $0x180] sm:$0xff]  ;;  %v509_v59 = vld [vmem:[%s2593_s5 + $0x188] sm:$0xff] }
  0x65   : > { %v514_v60 = vld [vmem:[%s2593_s5 + $0x1b0] sm:$0xff]  ;;  %v515_v61 = vld [vmem:[%s2593_s5 + $0x1b8] sm:$0xff]  ;;  %v512_v62 = vld [vmem:[%s2593_s5 + $0x1a0] sm:$0xff] }
  0x66   : > { %v513_v63 = vld [vmem:[%s2593_s5 + $0x1a8] sm:$0xff]  ;;  %v518_v0 = vld [vmem:[%s2593_s5 + $0x1d0] sm:$0xff]  ;;  %v519_v1 = vld [vmem:[%s2593_s5 + $0x1d8] sm:$0xff] }
  0x67   : > { %v516_v2 = vld [vmem:[%s2593_s5 + $0x1c0] sm:$0xff]  ;;  %v517_v3 = vld [vmem:[%s2593_s5 + $0x1c8] sm:$0xff]  ;;  %v522_v4 = vld [vmem:[%s2593_s5 + $0x1f0] sm:$0xff] }
  0x68   : > { %842 = vmatmul.f32.gmra.mxu2 %v470_v16  ;;  %v523_v5 = vld [vmem:[%s2593_s5 + $0x1f8] sm:$0xff]  ;;  %v520_v6 = vld [vmem:[%s2593_s5 + $0x1e0] sm:$0xff]  ;;  %v521_v7 = vld [vmem:[%s2593_s5 + $0x1e8] sm:$0xff] }
  0x69   : > { %2153 = vmatmul.msk.f32.gmra.mxu3 %vm560_vm0, %v471_v17  ;;  %v526_v8 = vld [vmem:[%s2593_s5 + $0x210] sm:$0xff]  ;;  %v527_v9 = vld [vmem:[%s2593_s5 + $0x218] sm:$0xff]  ;;  %v524_v11 = vld [vmem:[%s2593_s5 + $0x200] sm:$0xff] }
  0x6a   : > { %v525_v13 = vld [vmem:[%s2593_s5 + $0x208] sm:$0xff] }
  0x6b   : > { %658 = vmatmul.f32.gmra.mxu0 %v468_v18  ;;  %v530_v18 = vld [vmem:[%s2593_s5 + $0x230] sm:$0xff] }
  0x6c   : > { %750 = vmatmul.f32.gmra.mxu1 %v469_v19 }
  0x70   : > { %845 = vmatmul.f32.gmra.mxu2 %v474_v20  ;;  %v531_v20 = vld [vmem:[%s2593_s5 + $0x238] sm:$0xff] }
  0x71   : > { %2154 = vmatmul.msk.f32.gmra.mxu3 %vm560_vm0, %v475_v21 }
  0x73   : > { %661 = vmatmul.f32.gmra.mxu0 %v472_v22 }
  0x74   : > { %753 = vmatmul.f32.gmra.mxu1 %v473_v23  ;;  %v528_v23 = vld [vmem:[%s2593_s5 + $0x220] sm:$0xff] }
  0x78   : > { %848 = vmatmul.f32.gmra.mxu2 %v478_v24 }
  0x79   : > { %2155 = vmatmul.msk.f32.gmra.mxu3 %vm560_vm0, %v479_v25  ;;  %v529_v25 = vld [vmem:[%s2593_s5 + $0x228] sm:$0xff] }
  0x7b   : > { %664 = vmatmul.f32.gmra.mxu0 %v476_v26 }
  0x7c   : > { %756 = vmatmul.f32.gmra.mxu1 %v477_v27 }
  0x80   : > { %851 = vmatmul.f32.gmra.mxu2 %v482_v28 }
  0x81   : > { %2156 = vmatmul.msk.f32.gmra.mxu3 %vm560_vm0, %v483_v29 }
  0x83   : > { %667 = vmatmul.f32.gmra.mxu0 %v480_v30  ;;  %v534_v30 = vld [vmem:[%s2593_s5 + $0x250] sm:$0xff] }
  0x84   : > { %759 = vmatmul.f32.gmra.mxu1 %v481_v31 }
  0x88   : > { %854 = vmatmul.f32.gmra.mxu2 %v486_v32  ;;  %v535_v32 = vld [vmem:[%s2593_s5 + $0x258] sm:$0xff] }
  0x89   : > { %2157 = vmatmul.msk.f32.gmra.mxu3 %vm560_vm0, %v487_v33 }
  0x8b   : > { %670 = vmatmul.f32.gmra.mxu0 %v484_v34 }
  0x8c   : > { %762 = vmatmul.f32.gmra.mxu1 %v485_v35  ;;  %v532_v35 = vld [vmem:[%s2593_s5 + $0x240] sm:$0xff] }
  0x90   : > { %857 = vmatmul.f32.gmra.mxu2 %v490_v36 }
  0x91   : > { %2158 = vmatmul.msk.f32.gmra.mxu3 %vm560_vm0, %v491_v37  ;;  %v533_v37 = vld [vmem:[%s2593_s5 + $0x248] sm:$0xff] }
  0x93   : > { %673 = vmatmul.f32.gmra.mxu0 %v488_v38 }
  0x94   : > { %765 = vmatmul.f32.gmra.mxu1 %v489_v39 }
  0x98   : > { %860 = vmatmul.f32.gmra.mxu2 %v494_v40 }
  0x99   : > { %2159 = vmatmul.msk.f32.gmra.mxu3 %vm560_vm0, %v495_v41 }
  0x9b   : > { %676 = vmatmul.f32.gmra.mxu0 %v492_v42  ;;  %v538_v42 = vld [vmem:[%s2593_s5 + $0x270] sm:$0xff] }
  0x9c   : > { %768 = vmatmul.f32.gmra.mxu1 %v493_v43 }
  0xa0   : > { %863 = vmatmul.f32.gmra.mxu2 %v498_v44  ;;  %v539_v44 = vld [vmem:[%s2593_s5 + $0x278] sm:$0xff] }
  0xa1   : > { %2160 = vmatmul.msk.f32.gmra.mxu3 %vm560_vm0, %v499_v45 }
  0xa3   : > { %679 = vmatmul.f32.gmra.mxu0 %v496_v46 }
  0xa4   : > { %771 = vmatmul.f32.gmra.mxu1 %v497_v47  ;;  %v536_v47 = vld [vmem:[%s2593_s5 + $0x260] sm:$0xff] }
  0xa8   : > { %866 = vmatmul.f32.gmra.mxu2 %v502_v48 }
  0xa9   : > { %2161 = vmatmul.msk.f32.gmra.mxu3 %vm560_vm0, %v503_v49  ;;  %v537_v49 = vld [vmem:[%s2593_s5 + $0x268] sm:$0xff] }
  0xab   : > { %682 = vmatmul.f32.gmra.mxu0 %v500_v50 }
  0xac   : > { %774 = vmatmul.f32.gmra.mxu1 %v501_v51 }
  0xb0   : > { %869 = vmatmul.f32.gmra.mxu2 %v506_v52 }
  0xb1   : > { %2162 = vmatmul.msk.f32.gmra.mxu3 %vm560_vm0, %v507_v53 }
  0xb3   : > { %685 = vmatmul.f32.gmra.mxu0 %v504_v54 }
  0xb4   : > { %777 = vmatmul.f32.gmra.mxu1 %v505_v55 }
  0xb8   : > { %872 = vmatmul.f32.gmra.mxu2 %v510_v56 }
  0xb9   : > { %2163 = vmatmul.msk.f32.gmra.mxu3 %vm560_vm0, %v511_v57 }
  0xbb   : > { %688 = vmatmul.f32.gmra.mxu0 %v508_v58 }
  0xbc   : > { %780 = vmatmul.f32.gmra.mxu1 %v509_v59 }
  0xc0   : > { %875 = vmatmul.f32.gmra.mxu2 %v514_v60 }
  0xc1   : > { %2164 = vmatmul.msk.f32.gmra.mxu3 %vm560_vm0, %v515_v61 }
  0xc3   : > { %691 = vmatmul.f32.gmra.mxu0 %v512_v62 }
  0xc4   : > { %783 = vmatmul.f32.gmra.mxu1 %v513_v63 }
  0xc8   : > { %878 = vmatmul.f32.gmra.mxu2 %v518_v0 }
  0xc9   : > { %2165 = vmatmul.msk.f32.gmra.mxu3 %vm560_vm0, %v519_v1 }
  0xcb   : > { %694 = vmatmul.f32.gmra.mxu0 %v516_v2 }
  0xcc   : > { %786 = vmatmul.f32.gmra.mxu1 %v517_v3 }
  0xd0   : > { %881 = vmatmul.f32.gmra.mxu2 %v522_v4 }
  0xd1   : > { %2166 = vmatmul.msk.f32.gmra.mxu3 %vm560_vm0, %v523_v5 }
  0xd3   : > { %697 = vmatmul.f32.gmra.mxu0 %v520_v6 }
  0xd4   : > { %789 = vmatmul.f32.gmra.mxu1 %v521_v7 }
  0xd8   : > { %884 = vmatmul.f32.gmra.mxu2 %v526_v8  ;;  %v653_v10 = vpop.f32.mrf.mxu0 }
  0xd9   : > { %v745_v12 = vpop.f32.mrf.mxu1  ;;  %2167 = vmatmul.msk.f32.gmra.mxu3 %vm560_vm0, %v527_v9 }
  0xda   : > { %v746_v14 = vadd.f32 %v745_v12, %v653_v10 }
  0xdb   : > { %v837_v15 = vpop.f32.mrf.mxu2  ;;  %700 = vmatmul.f32.gmra.mxu0 %v524_v11 }
  0xdc   : > { %v838_v16 = vadd.f32 %v837_v15, %v746_v14  ;;  %792 = vmatmul.f32.gmra.mxu1 %v525_v13  ;;  %v929_v17 = vpop.f32.mrf.mxu3  ;;  %v542_v14 = vld [vmem:[%s2593_s5 + $0x290] sm:$0xff] }
  0xde   : > { %v2835_v19 = vadd.f32 %v929_v17, %v838_v16  ;;  %v543_v16 = vld [vmem:[%s2593_s5 + $0x298] sm:$0xff] }
  0xe0   : > { %887 = vmatmul.f32.gmra.mxu2 %v530_v18  ;;  %1004 = vadd.xlane.f32.xlu0 %v2835_v19  ;;  %v656_v21 = vpop.f32.mrf.mxu0  ;;  %v1054_v22 = vmul.f32 %v2835_v19, %v2835_v19 }
  0xe1   : > { %v748_v24 = vpop.f32.mrf.mxu1  ;;  %2168 = vmatmul.msk.f32.gmra.mxu3 %vm560_vm0, %v531_v20 }
  0xe2   : > { %v749_v26 = vadd.f32 %v748_v24, %v656_v21  ;;  %1079 = vadd.xlane.f32.xlu1 %v1054_v22  ;;  %v540_v21 = vld [vmem:[%s2593_s5 + $0x280] sm:$0xff]  ;;  %v541_v22 = vld [vmem:[%s2593_s5 + $0x288] sm:$0xff] }
  0xe3   : > { %v840_v27 = vpop.f32.mrf.mxu2  ;;  %703 = vmatmul.f32.gmra.mxu0 %v528_v23 }
  0xe4   : > { %v841_v28 = vadd.f32 %v840_v27, %v749_v26  ;;  %795 = vmatmul.f32.gmra.mxu1 %v529_v25  ;;  %v932_v29 = vpop.f32.mrf.mxu3 }
  0xe6   : > { %v2845_v31 = vadd.f32 %v932_v29, %v841_v28  ;;  %v546_v28 = vld [vmem:[%s2593_s5 + $0x2b0] sm:$0xff] }
  0xe8   : > { %890 = vmatmul.f32.gmra.mxu2 %v534_v30  ;;  %1006 = vadd.xlane.f32.xlu0 %v2845_v31  ;;  %v659_v33 = vpop.f32.mrf.mxu0  ;;  %v1055_v34 = vmul.f32 %v2845_v31, %v2845_v31 }
  0xe9   : > { %v751_v36 = vpop.f32.mrf.mxu1  ;;  %2169 = vmatmul.msk.f32.gmra.mxu3 %vm560_vm0, %v535_v32 }
  0xea   : > { %v752_v38 = vadd.f32 %v751_v36, %v659_v33  ;;  %1081 = vadd.xlane.f32.xlu2 %v1055_v34  ;;  %v547_v33 = vld [vmem:[%s2593_s5 + $0x2b8] sm:$0xff]  ;;  %v544_v36 = vld [vmem:[%s2593_s5 + $0x2a0] sm:$0xff] }
  0xeb   : > { %v843_v39 = vpop.f32.mrf.mxu2  ;;  %706 = vmatmul.f32.gmra.mxu0 %v532_v35 }
  0xec   : > { %v844_v40 = vadd.f32 %v843_v39, %v752_v38  ;;  %798 = vmatmul.f32.gmra.mxu1 %v533_v37  ;;  %v935_v41 = vpop.f32.mrf.mxu3  ;;  %v545_v37 = vld [vmem:[%s2593_s5 + $0x2a8] sm:$0xff] }
  0xee   : > { %v2855_v43 = vadd.f32 %v935_v41, %v844_v40 }
  0xf0   : > { %1008 = vadd.xlane.f32.xlu1 %v2855_v43  ;;  %v662_v45 = vpop.f32.mrf.mxu0  ;;  %893 = vmatmul.f32.gmra.mxu2 %v538_v42  ;;  %v1056_v46 = vmul.f32 %v2855_v43, %v2855_v43 }
  0xf1   : > { %v754_v48 = vpop.f32.mrf.mxu1  ;;  %2170 = vmatmul.msk.f32.gmra.mxu3 %vm560_vm0, %v539_v44 }
  0xf2   : > { %v755_v50 = vadd.f32 %v754_v48, %v662_v45  ;;  %1083 = vadd.xlane.f32.xlu0 %v1056_v46  ;;  %v550_v48 = vld [vmem:[%s2593_s5 + $0x2d0] sm:$0xff] }
  0xf3   : > { %v846_v51 = vpop.f32.mrf.mxu2  ;;  %709 = vmatmul.f32.gmra.mxu0 %v536_v47 }
  0xf4   : > { %v847_v52 = vadd.f32 %v846_v51, %v755_v50  ;;  %801 = vmatmul.f32.gmra.mxu1 %v537_v49  ;;  %v938_v53 = vpop.f32.mrf.mxu3  ;;  %v551_v51 = vld [vmem:[%s2593_s5 + $0x2d8] sm:$0xff] }
  0xf6   : > { %v2864_v54 = vadd.f32 %v938_v53, %v847_v52 }
  0xf8   : > { %1010 = vadd.xlane.f32.xlu1 %v2864_v54  ;;  %v665_v55 = vpop.f32.mrf.mxu0  ;;  %v1057_v62 = vmul.f32 %v2864_v54, %v2864_v54  ;;  %896 = vmatmul.f32.gmra.mxu2 %v542_v14 }
  0xf9   : > { %v757_v56 = vpop.f32.mrf.mxu1  ;;  %2171 = vmatmul.msk.f32.gmra.mxu3 %vm560_vm0, %v543_v16 }
  0xfa   : > { %v758_v57 = vadd.f32 %v757_v56, %v665_v55  ;;  %v548_v55 = vld [vmem:[%s2593_s5 + $0x2c0] sm:$0xff]  ;;  %v549_v56 = vld [vmem:[%s2593_s5 + $0x2c8] sm:$0xff] }
  0xfb   : > { %v849_v58 = vpop.f32.mrf.mxu2  ;;  %712 = vmatmul.f32.gmra.mxu0 %v540_v21 }
  0xfc   : > { %v850_v59 = vadd.f32 %v849_v58, %v758_v57  ;;  %v941_v60 = vpop.f32.mrf.mxu3  ;;  %804 = vmatmul.f32.gmra.mxu1 %v541_v22 }
  0xfe   : > { %v2867_v61 = vadd.f32 %v941_v60, %v850_v59 }
 0x100   : > { %1085 = vadd.xlane.f32.xlu1 %v1057_v62  ;;  %1012 = vadd.xlane.f32.xlu2 %v2867_v61  ;;  %v668_v63 = vpop.f32.mrf.mxu0  ;;  %v1058_v6 = vmul.f32 %v2867_v61, %v2867_v61 }
 0x101   : > { %v760_v0 = vpop.f32.mrf.mxu1  ;;  %899 = vmatmul.f32.gmra.mxu2 %v546_v28  ;;  %2172 = vmatmul.msk.f32.gmra.mxu3 %vm560_vm0, %v547_v33 }
 0x102   : > { %v761_v1 = vadd.f32 %v760_v0, %v668_v63 }
 0x103   : > { %v852_v2 = vpop.f32.mrf.mxu2  ;;  %715 = vmatmul.f32.gmra.mxu0 %v544_v36 }
 0x104   : > { %v853_v3 = vadd.f32 %v852_v2, %v761_v1  ;;  %v944_v4 = vpop.f32.mrf.mxu3  ;;  %807 = vmatmul.f32.gmra.mxu1 %v545_v37 }
 0x106   : > { %v2872_v5 = vadd.f32 %v944_v4, %v853_v3 }
 0x108   : > { %1087 = vadd.xlane.f32.xlu2 %v1058_v6  ;;  %v671_v7 = vpop.f32.mrf.mxu0  ;;  %v1059_v8 = vmul.f32 %v2872_v5, %v2872_v5 }
 0x109   : > { %v763_v9 = vpop.f32.mrf.mxu1  ;;  %902 = vmatmul.f32.gmra.mxu2 %v550_v48  ;;  %2173 = vmatmul.msk.f32.gmra.mxu3 %vm560_vm0, %v551_v51 }
 0x10a   : > { %v764_v10 = vadd.f32 %v763_v9, %v671_v7  ;;  %1089 = vadd.xlane.f32.xlu0 %v1059_v8 }
 0x10b   : > { %v855_v11 = vpop.f32.mrf.mxu2  ;;  %718 = vmatmul.f32.gmra.mxu0 %v548_v55 }
 0x10c   : > { %v856_v12 = vadd.f32 %v855_v11, %v764_v10  ;;  %v947_v13 = vpop.f32.mrf.mxu3  ;;  %810 = vmatmul.f32.gmra.mxu1 %v549_v56 }
 0x10e   : > { %v2879_v15 = vadd.f32 %v947_v13, %v856_v12 }
 0x110   : > { %1014 = vadd.xlane.f32.xlu2 %v2872_v5  ;;  %v674_v17 = vpop.f32.mrf.mxu0  ;;  %v1060_v18 = vmul.f32 %v2879_v15, %v2879_v15 }
 0x111   : > { %v766_v20 = vpop.f32.mrf.mxu1 }
 0x112   : > { %v767_v23 = vadd.f32 %v766_v20, %v674_v17  ;;  %1016 = vadd.xlane.f32.xlu0 %v2879_v15  ;;  %1091 = vadd.xlane.f32.xlu1 %v1060_v18 }
 0x113   : > { %v858_v24 = vpop.f32.mrf.mxu2 }
 0x114   : > { %v859_v25 = vadd.f32 %v858_v24, %v767_v23  ;;  %v950_v26 = vpop.f32.mrf.mxu3 }
 0x116   : > { %v2889_v27 = vadd.f32 %v950_v26, %v859_v25 }
 0x118   : > { %v677_v29 = vpop.f32.mrf.mxu0  ;;  %v1061_v30 = vmul.f32 %v2889_v27, %v2889_v27 }
 0x119   : > { %v769_v32 = vpop.f32.mrf.mxu1 }
 0x11a   : > { %v770_v34 = vadd.f32 %v769_v32, %v677_v29  ;;  %1018 = vadd.xlane.f32.xlu1 %v2889_v27  ;;  %1093 = vadd.xlane.f32.xlu2 %v1061_v30 }
 0x11b   : > { %v861_v35 = vpop.f32.mrf.mxu2 }
 0x11c   : > { %v862_v38 = vadd.f32 %v861_v35, %v770_v34  ;;  %v953_v39 = vpop.f32.mrf.mxu3 }
 0x11e   : > { %v2899_v40 = vadd.f32 %v953_v39, %v862_v38 }
 0x120   : > { %v680_v41 = vpop.f32.mrf.mxu0  ;;  %v1062_v42 = vmul.f32 %v2899_v40, %v2899_v40 }
 0x121   : > { %v772_v44 = vpop.f32.mrf.mxu1 }
 0x122   : > { %v773_v45 = vadd.f32 %v772_v44, %v680_v41  ;;  %1020 = vadd.xlane.f32.xlu2 %v2899_v40  ;;  %1095 = vadd.xlane.f32.xlu0 %v1062_v42 }
 0x123   : > { %v864_v46 = vpop.f32.mrf.mxu2 }
 0x124   : > { %v865_v47 = vadd.f32 %v864_v46, %v773_v45  ;;  %v956_v49 = vpop.f32.mrf.mxu3 }
 0x126   : > { %v2905_v50 = vadd.f32 %v956_v49, %v865_v47 }
 0x128   : > { %3793 = vst [vmem:[#allocation11_spill] sm:$0xff] %v2905_v50  ;;  %v683_v52 = vpop.f32.mrf.mxu0  ;;  %v1063_v53 = vmul.f32 %v2905_v50, %v2905_v50 }
 0x129   : > { %v775_v57 = vpop.f32.mrf.mxu1 }
 0x12a   : > { %v776_v58 = vadd.f32 %v775_v57, %v683_v52  ;;  %1022 = vadd.xlane.f32.xlu0 %v2905_v50  ;;  %1097 = vadd.xlane.f32.xlu1 %v1063_v53 }
 0x12b   : > { %v867_v59 = vpop.f32.mrf.mxu2 }
 0x12c   : > { %v868_v60 = vadd.f32 %v867_v59, %v776_v58  ;;  %v959_v62 = vpop.f32.mrf.mxu3 }
 0x12e   : > { %v2914_v63 = vadd.f32 %v959_v62, %v868_v60 }
 0x130   : > { %v686_v0 = vpop.f32.mrf.mxu0  ;;  %v1064_v1 = vmul.f32 %v2914_v63, %v2914_v63 }
 0x131   : > { %v778_v2 = vpop.f32.mrf.mxu1 }
 0x132   : > { %v779_v3 = vadd.f32 %v778_v2, %v686_v0  ;;  %1024 = vadd.xlane.f32.xlu1 %v2914_v63  ;;  %1099 = vadd.xlane.f32.xlu2 %v1064_v1  ;;  %v554_v0 = vld [vmem:[%s2593_s5 + $0x2f0] sm:$0xff] }
 0x133   : > { %v870_v4 = vpop.f32.mrf.mxu2  ;;  %905 = vmatmul.f32.gmra.mxu2 %v554_v0 }
 0x134   : > { %v871_v6 = vadd.f32 %v870_v4, %v779_v3  ;;  %v962_v7 = vpop.f32.mrf.mxu3 }
 0x136   : > { %v2919_v8 = vadd.f32 %v962_v7, %v871_v6  ;;  %v555_v6 = vld [vmem:[%s2593_s5 + $0x2f8] sm:$0xff] }
 0x137   : > { %2174 = vmatmul.msk.f32.gmra.mxu3 %vm560_vm0, %v555_v6 }
 0x138   : > { %3794 = vst [vmem:[#allocation12_spill] sm:$0xff] %v2919_v8  ;;  %v689_v9 = vpop.f32.mrf.mxu0  ;;  %v1065_v10 = vmul.f32 %v2919_v8, %v2919_v8 }
 0x139   : > { %v781_v11 = vpop.f32.mrf.mxu1 }
 0x13a   : > { %v782_v12 = vadd.f32 %v781_v11, %v689_v9  ;;  %1026 = vadd.xlane.f32.xlu2 %v2919_v8  ;;  %1101 = vadd.xlane.f32.xlu0 %v1065_v10  ;;  %v552_v11 = vld [vmem:[%s2593_s5 + $0x2e0] sm:$0xff] }
 0x13b   : > { %v873_v13 = vpop.f32.mrf.mxu2  ;;  %721 = vmatmul.f32.gmra.mxu0 %v552_v11 }
 0x13c   : > { %v874_v14 = vadd.f32 %v873_v13, %v782_v12  ;;  %v965_v16 = vpop.f32.mrf.mxu3  ;;  %v553_v12 = vld [vmem:[%s2593_s5 + $0x2e8] sm:$0xff] }
 0x13d   : > { %813 = vmatmul.f32.gmra.mxu1 %v553_v12 }
 0x13e   : > { %v2924_v17 = vadd.f32 %v965_v16, %v874_v14 }
 0x140   : > { %3795 = vst [vmem:[#allocation13_spill] sm:$0xff] %v2924_v17  ;;  %v692_v18 = vpop.f32.mrf.mxu0  ;;  %v1066_v20 = vmul.f32 %v2924_v17, %v2924_v17 }
 0x141   : > { %v784_v21 = vpop.f32.mrf.mxu1 }
 0x142   : > { %v785_v22 = vadd.f32 %v784_v21, %v692_v18  ;;  %1028 = vadd.xlane.f32.xlu0 %v2924_v17  ;;  %1103 = vadd.xlane.f32.xlu1 %v1066_v20 }
 0x143   : > { %v876_v23 = vpop.f32.mrf.mxu2 }
 0x144   : > { %v877_v24 = vadd.f32 %v876_v23, %v785_v22  ;;  %v968_v25 = vpop.f32.mrf.mxu3 }
 0x146   : > { %v2929_v26 = vadd.f32 %v968_v25, %v877_v24 }
 0x148   : > { %v695_v28 = vpop.f32.mrf.mxu0  ;;  %v1067_v29 = vmul.f32 %v2929_v26, %v2929_v26 }
 0x149   : > { %v787_v30 = vpop.f32.mrf.mxu1 }
 0x14a   : > { %v788_v32 = vadd.f32 %v787_v30, %v695_v28  ;;  %1030 = vadd.xlane.f32.xlu1 %v2929_v26  ;;  %1105 = vadd.xlane.f32.xlu2 %v1067_v29 }
 0x14b   : > { %v879_v33 = vpop.f32.mrf.mxu2 }
 0x14c   : > { %v880_v34 = vadd.f32 %v879_v33, %v788_v32  ;;  %v971_v35 = vpop.f32.mrf.mxu3  ;;  %v558_v33 = vld [vmem:[%s2593_s5 + $0x310] sm:$0xff] }
 0x14d   : > { %908 = vmatmul.f32.gmra.mxu2 %v558_v33 }
 0x14e   : > { %v2934_v36 = vadd.f32 %v971_v35, %v880_v34 }
 0x150   : > { %3796 = vst [vmem:[#allocation14_spill] sm:$0xff] %v2934_v36  ;;  %v698_v37 = vpop.f32.mrf.mxu0  ;;  %v1068_v38 = vmul.f32 %v2934_v36, %v2934_v36 }
 0x151   : > { %v790_v39 = vpop.f32.mrf.mxu1 }
 0x152   : > { %v791_v41 = vadd.f32 %v790_v39, %v698_v37  ;;  %1032 = vadd.xlane.f32.xlu2 %v2934_v36  ;;  %1107 = vadd.xlane.f32.xlu0 %v1068_v38  ;;  %v3772_v38 = vmov 0   ;;  %v559_v39 = vld [vmem:[%s2593_s5 + $0x318] sm:$0xff] }
 0x153   : > { %v882_v42 = vpop.f32.mrf.mxu2  ;;  %v1005_v44 = vpop.xlane.xlu0 %1004  ;;  %2252 = vset.pattern.permute.xlu0 %v3772_v38  ;;  %2253 = vset.pattern.permute.xlu2 %v3772_v38 }
 0x154   : > { %v883_v45 = vadd.f32 %v882_v42, %v791_v41  ;;  %v2939_v46 = vmul.f32 0.020408163, %v1005_v44  ;;  %v974_v47 = vpop.f32.mrf.mxu3  ;;  %2254 = vset.pattern.permute.xlu1 %v3772_v38  ;;  %2175 = vmatmul.msk.f32.gmra.mxu3 %vm560_vm0, %v559_v39 }
 0x155   : > { %v1080_v48 = vpop.xlane.xlu1 %1079 }
 0x156   : > { %v1179_v49 = vmul.f32 %v2939_v46, %v2939_v46  ;;  %v2943_v51 = vadd.f32 %v974_v47, %v883_v45  ;;  %v1154_v52 = vmul.f32 0.020408163, %v1080_v48  ;;  %v556_v48 = vld [vmem:[%s2593_s5 + $0x300] sm:$0xff] }
 0x157   : > { %724 = vmatmul.f32.gmra.mxu0 %v556_v48 }
 0x158   : > { %3797 = vst [vmem:[#allocation15_spill] sm:$0xff] %v2943_v51  ;;  %v1204_v53 = vsub.f32 %v1154_v52, %v1179_v49  ;;  %v701_v55 = vpop.f32.mrf.mxu0  ;;  %v1069_v56 = vmul.f32 %v2943_v51, %v2943_v51  ;;  %v557_v49 = vld [vmem:[%s2593_s5 + $0x308] sm:$0xff]  ;;  %s2150_s5 = sshll.u32 %s3846_s14, 3  ;;  %s2401_s14 = scalar_lea.hbm %s2400_s13, 200 }
 0x159   : > { %v793_v57 = vpop.f32.mrf.mxu1  ;;  %816 = vmatmul.f32.gmra.mxu1 %v557_v49  ;;  %s3004_s25 = scalar_lea.vmem %s3770_s3, %s2150_s5  ;;  %p2402_p4 = scmp.ne.s32.totalorder %s2400_s13, %s2401_s14 }
 0x15a   : > { %v2947_v58 = vadd.f32 1e-05, %v1204_v53  ;;  %v794_v59 = vadd.f32 %v793_v57, %v701_v55  ;;  %1034 = vadd.xlane.f32.xlu0 %v2943_v51  ;;  %1109 = vadd.xlane.f32.xlu1 %v1069_v56  ;;  %p2407_p2 = scmp.lt.s32.totalorder %s2405_s10, %s2401_s14 }
 0x15b   : > { %v885_v60 = vpop.f32.mrf.mxu2  ;;  %v1007_v62 = vpop.xlane.xlu0 %1006  ;;  %p2403_p8 = pnand %p2402_p4, %p2559_p7 }
 0x15c   : > { %2274 = vrsqrt.f32 %v2947_v58  ;;  %v886_v1 = vadd.f32 %v885_v60, %v794_v59  ;;  %v2952_v2 = vmul.f32 0.020408163, %v1007_v62  ;;  %v977_v3 = vpop.f32.mrf.mxu3  ;;  %vm1260_vm2 = vweird.f32 %v2947_v58  ;;  %p2408_p10 = por %p2407_p2, %p2406_p9 }
 0x15d   : > { %v1082_v4 = vpop.xlane.xlu2 %1081  ;;  %p2404_p11 = pneg %p2403_p8 }
 0x15e   : > { %v1180_v7 = vmul.f32 %v2952_v2, %v2952_v2  ;;  %v2957_v9 = vadd.f32 %v977_v3, %v886_v1  ;;  %v1155_v10 = vmul.f32 0.020408163, %v1082_v4 }
 0x15f   : > { %p2409_p12 = pnand %p2408_p10, %p2404_p11 }
 0x160   : > { %3798 = vst [vmem:[#allocation16_spill] sm:$0xff] %v2957_v9  ;;  %v1205_v13 = vsub.f32 %v1155_v10, %v1180_v7  ;;  %v704_v14 = vpop.f32.mrf.mxu0  ;;  %v1070_v16 = vmul.f32 %v2957_v9, %v2957_v9 }
 0x161   : > { %v796_v18 = vpop.f32.mrf.mxu1 }
 0x162   : > { %v2964_v20 = vpop.eup %2274  ;;  %v797_v21 = vadd.f32 %v796_v18, %v704_v14  ;;  %1036 = vadd.xlane.f32.xlu1 %v2957_v9  ;;  %1111 = vadd.xlane.f32.xlu2 %v1070_v16  ;;  %v2967_v24 = vadd.f32 1e-05, %v1205_v13 }
 0x163   : > { %v888_v22 = vpop.f32.mrf.mxu2  ;;  %v1009_v23 = vpop.xlane.xlu1 %1008  ;;  %v1255_v29 = vmul.f32 %v2964_v20, %v2947_v58  ;;  %vm1261_vm1 = vweird.f32 %v2964_v20 }
 0x164   : > { %v889_v25 = vadd.f32 %v888_v22, %v797_v21  ;;  %v2969_v28 = vmul.f32 0.020408163, %v1009_v23  ;;  %v980_v30 = vpop.f32.mrf.mxu3  ;;  %2276 = vrsqrt.f32 %v2967_v24  ;;  %vm1262_vm3 = vmor %vm1260_vm2, %vm1261_vm1  ;;  %vm1270_vm5 = vweird.f32 %v2967_v24 }
 0x165   : > { %v1084_v32 = vpop.xlane.xlu0 %1083  ;;  %v1256_v44 = vmul.f32 %v2964_v20, %v1255_v29 }
 0x166   : > { %v1181_v34 = vmul.f32 %v2969_v28, %v2969_v28  ;;  %v2976_v35 = vadd.f32 %v980_v30, %v889_v25  ;;  %v1156_v37 = vmul.f32 0.020408163, %v1084_v32  ;;  %v3011_v25 = vld [vmem:[%s3004_s25] sm:$0xff] }
 0x167   : > { %v1257_v56 = vmul.f32 0.5, %v1256_v44 }
 0x168   : > { %3799 = vst [vmem:[#allocation17_spill] sm:$0xff] %v2976_v35  ;;  %v707_v41 = vpop.f32.mrf.mxu0  ;;  %v1071_v42 = vmul.f32 %v2976_v35, %v2976_v35  ;;  %v1206_v45 = vsub.f32 %v1156_v37, %v1181_v34 }
 0x169   : > { %v799_v47 = vpop.f32.mrf.mxu1  ;;  %v1258_v3 = vsub.f32 1.5, %v1257_v56 }
 0x16a   : > { %v800_v52 = vadd.f32 %v799_v47, %v707_v41  ;;  %1038 = vadd.xlane.f32.xlu2 %v2976_v35  ;;  %1113 = vadd.xlane.f32.xlu0 %v1071_v42  ;;  %v1231_v57 = vadd.f32 1e-05, %v1206_v45  ;;  %v2277_v60 = vpop.eup %2276  ;;  %v3019_v45 = vld [vmem:[%s3004_s25 + $0x8] sm:$0xff] }
 0x16b   : > { %v891_v53 = vpop.f32.mrf.mxu2  ;;  %v1265_v4 = vmul.f32 %v2277_v60, %v2967_v24  ;;  %v1259_v16 = vmul.f32 %v2964_v20, %v1258_v3  ;;  %vm1271_vm4 = vweird.f32 %v2277_v60 }
 0x16c   : > { %v892_v55 = vadd.f32 %v891_v53, %v800_v52  ;;  %v983_v59 = vpop.f32.mrf.mxu3  ;;  %2278 = vrsqrt.f32 %v1231_v57  ;;  %vm1272_vm6 = vmor %vm1270_vm5, %vm1271_vm4  ;;  %vm1280_vm8 = vweird.f32 %v1231_v57 }
 0x16d   : > { %v1266_v12 = vmul.f32 %v2277_v60, %v1265_v4  ;;  %v1263_v23 = vsel %vm1262_vm3, %v2964_v20, %v1259_v16 }
 0x16e   : > { %v2991_v62 = vadd.f32 %v983_v59, %v892_v55  ;;  %v1529_v32 = vmul.f32 %v3011_v25, %v1263_v23  ;;  %v3025_v59 = vld [vmem:[%s3004_s25 + $0x10] sm:$0xff] }
 0x16f   : > { %v1267_v22 = vmul.f32 0.5, %v1266_v12 }
 0x170   : > { %3800 = vst [vmem:[#allocation18_spill] sm:$0xff] %v2991_v62  ;;  %v1072_v0 = vmul.f32 %v2991_v62, %v2991_v62  ;;  %v710_v1 = vpop.f32.mrf.mxu0  ;;  %v1554_v37 = vmul.f32 %v1529_v32, %v2939_v46 }
 0x171   : > { %v802_v6 = vpop.f32.mrf.mxu1  ;;  %v1268_v33 = vsub.f32 1.5, %v1267_v22 }
 0x172   : > { %1040 = vadd.xlane.f32.xlu0 %v2991_v62  ;;  %1115 = vadd.xlane.f32.xlu1 %v1072_v0  ;;  %v803_v7 = vadd.f32 %v802_v6, %v710_v1  ;;  %v2279_v18 = vpop.eup %2278  ;;  %v1011_v6 = vpop.xlane.xlu1 %1010 }
 0x173   : > { %v2997_v10 = vpop.xlane.xlu2 %1012  ;;  %v894_v11 = vpop.f32.mrf.mxu2  ;;  %v1275_v29 = vmul.f32 %v2279_v18, %v1231_v57  ;;  %v1269_v58 = vmul.f32 %v2277_v60, %v1268_v33  ;;  %vm1281_vm7 = vweird.f32 %v2279_v18  ;;  %v3039_v23 = vmul.f32 0.020408163, %v1011_v6 }
 0x174   : > { %v895_v13 = vadd.f32 %v894_v11, %v803_v7  ;;  %v986_v14 = vpop.f32.mrf.mxu3  ;;  %vm1282_vm9 = vmor %vm1280_vm8, %vm1281_vm7  ;;  %v1509_v11 = vld [vmem:[%s3004_s25 + $0x28] sm:$0xff] }
 0x175   : > { %v1276_v34 = vmul.f32 %v2279_v18, %v1275_v29  ;;  %v1273_v44 = vsel %vm1272_vm6, %v2277_v60, %v1269_v58 }
 0x176   : > { %v3007_v21 = vadd.f32 %v986_v14, %v895_v13  ;;  %v1530_v52 = vmul.f32 %v3019_v45, %v1273_v44  ;;  %v3034_v14 = vmul.f32 0.020408163, %v2997_v10 }
 0x177   : > { %v1277_v39 = vmul.f32 0.5, %v1276_v34 }
 0x178   : > { %3801 = vst [vmem:[#allocation19_spill] sm:$0xff] %v3007_v21  ;;  %v1555_v24 = vmul.f32 %v1530_v52, %v2952_v2 }
 0x179   : > { %v1278_v47 = vsub.f32 1.5, %v1277_v39  ;;  %v805_v33 = vpop.f32.mrf.mxu1 }
 0x17a   : > { %1042 = vadd.xlane.f32.xlu1 %v3007_v21 }
 0x17b   : > { %v1088_v30 = vpop.xlane.xlu2 %1087  ;;  %v1279_v55 = vmul.f32 %v2279_v18, %v1278_v47  ;;  %v897_v39 = vpop.f32.mrf.mxu2  ;;  %v1073_v47 = vmul.f32 %v3007_v21, %v3007_v21 }
 0x17c   : > { %v1158_v22 = vmul.f32 0.020408163, %v1088_v30  ;;  %v989_v44 = vpop.f32.mrf.mxu3 }
 0x17d   : > { %v1090_v20 = vpop.xlane.xlu0 %1089  ;;  %v1283_v56 = vsel %vm1282_vm9, %v2279_v18, %v1279_v55  ;;  %v1086_v18 = vpop.xlane.xlu1 %1085 }
 0x17e   : > { %v1159_v48 = vmul.f32 0.020408163, %v1090_v20  ;;  %v1531_v60 = vmul.f32 %v3025_v59, %v1283_v56  ;;  %v1157_v29 = vmul.f32 0.020408163, %v1086_v18 }
 0x180   : > { %v1556_v57 = vmul.f32 %v1531_v60, %v2969_v28  ;;  %v1183_v28 = vmul.f32 %v3034_v14, %v3034_v14 }
 0x182   : > { %1604 = vrot.lane.b32.xlu2 %v1554_v37, %s2463_s30  ;;  %v1208_v34 = vsub.f32 %v1158_v22, %v1183_v28  ;;  %v1182_v37 = vmul.f32 %v3039_v23, %v3039_v23 }
 0x183   : > { %v1015_v41 = vpop.xlane.xlu2 %1014 }
 0x184   : > { %v1134_v42 = vmul.f32 0.020408163, %v1015_v41  ;;  %v1207_v10 = vsub.f32 %v1157_v29, %v1182_v37  ;;  %v1233_v20 = vadd.f32 1e-05, %v1208_v34  ;;  %v900_v55 = vpop.f32.mrf.mxu2 }
 0x186   : > { %v1184_v49 = vmul.f32 %v1134_v42, %v1134_v42  ;;  %1706 = vperm.xlu0 %2252, %v1529_v32   ;;  %v713_v32 = vpop.f32.mrf.mxu0  ;;  %vm1300_vm14 = vweird.f32 %v1233_v20 }
 0x187   : > { %v806_v58 = vadd.f32 %v805_v33, %v713_v32 }
 0x188   : > { %v1209_v46 = vsub.f32 %v1159_v48, %v1184_v49  ;;  %v808_v49 = vpop.f32.mrf.mxu1 }
 0x189   : > { %v898_v41 = vadd.f32 %v897_v39, %v806_v58  ;;  %v3060_v39 = vld [vmem:[%s3004_s25 + $0x20] sm:$0xff] }
 0x18a   : > { %v1234_v53 = vadd.f32 1e-05, %v1209_v46  ;;  %1711 = vperm.xlu2 %2253, %v1530_v52  }
 0x18b   : > { %v3045_v30 = vadd.f32 %v989_v44, %v898_v41  ;;  %v3064_v44 = vld [vmem:[%s3004_s25 + $0x18] sm:$0xff] }
 0x18c   : > { %2280 = vrsqrt.f32 %v1234_v53  ;;  %vm1310_vm11 = vweird.f32 %v1234_v53  ;;  %v903_v22 = vpop.f32.mrf.mxu2 }
 0x18d   : > { %2282 = vrsqrt.f32 %v1233_v20  ;;  %3802 = vst [vmem:[#allocation20_spill] sm:$0xff] %v3045_v30  ;;  %v1074_v52 = vmul.f32 %v3045_v30, %v3045_v30 }
 0x18e   : > { %1606 = vrot.lane.b32.xlu0 %v1555_v24, %s2463_s30  ;;  %v716_v48 = vpop.f32.mrf.mxu0 }
 0x192   : > { %v2281_v0 = vpop.eup %2280 }
 0x193   : > { %v1305_v1 = vmul.f32 %v2281_v0, %v1234_v53  ;;  %1716 = vperm.xlu1 %2254, %v1531_v60   ;;  %vm1311_vm10 = vweird.f32 %v2281_v0  ;;  %v2283_v46 = vpop.eup %2282  ;;  %v809_v53 = vadd.f32 %v808_v49, %v716_v48  ;;  %v1094_v49 = vpop.xlane.xlu2 %1093 }
 0x194   : > { %vm1312_vm12 = vmor %vm1310_vm11, %vm1311_vm10  ;;  %v1295_v56 = vmul.f32 %v2283_v46, %v1233_v20  ;;  %vm1301_vm13 = vweird.f32 %v2283_v46 }
 0x195   : > { %v1306_v3 = vmul.f32 %v2281_v0, %v1305_v1  ;;  %v901_v60 = vadd.f32 %v900_v55, %v809_v53  ;;  %vm1302_vm15 = vmor %vm1300_vm14, %vm1301_vm13 }
 0x197   : > { %v1307_v4 = vmul.f32 0.5, %v1306_v3  ;;  %v1296_v3 = vmul.f32 %v2283_v46, %v1295_v56 }
 0x199   : > { %v1308_v7 = vsub.f32 1.5, %v1307_v4 }
 0x19b   : > { %v1309_v2 = vmul.f32 %v2281_v0, %v1308_v7  ;;  %1608 = vrot.lane.b32.xlu1 %v1556_v57, %s2463_s30  ;;  %v719_v7 = vpop.f32.mrf.mxu0  ;;  %v811_v57 = vpop.f32.mrf.mxu1 }
 0x19c   : > { %v1021_v53 = vpop.xlane.xlu2 %1020 }
 0x19d   : > { %v1313_v12 = vsel %vm1312_vm12, %v2281_v0, %v1309_v2  ;;  %v992_v0 = vpop.f32.mrf.mxu3 }
 0x19e   : > { %v3031_v13 = vmul.f32 %v1509_v11, %v1313_v12  ;;  %v3052_v4 = vadd.f32 %v992_v0, %v901_v60  ;;  %v1297_v11 = vmul.f32 0.5, %v1296_v3  ;;  %v812_v12 = vadd.f32 %v811_v57, %v719_v7 }
 0x1a0   : > { %v3037_v16 = vmul.f32 %v3031_v13, %v1134_v42  ;;  %v1232_v42 = vadd.f32 1e-05, %v1207_v10  ;;  %3803 = vst [vmem:[#allocation21_spill] sm:$0xff] %v3052_v4  ;;  %v1075_v2 = vmul.f32 %v3052_v4, %v3052_v4  ;;  %v1298_v28 = vsub.f32 1.5, %v1297_v11 }
 0x1a1   : > { %v904_v29 = vadd.f32 %v903_v22, %v812_v12 }
 0x1a2   : > { %2284 = vrsqrt.f32 %v1232_v42  ;;  %v1299_v34 = vmul.f32 %v2283_v46, %v1298_v28  ;;  %vm1290_vm1 = vweird.f32 %v1232_v42 }
 0x1a4   : > { %v1303_v10 = vsel %vm1302_vm15, %v2283_v46, %v1299_v34 }
 0x1a5   : > { %v995_v33 = vpop.f32.mrf.mxu3  ;;  %v1100_v56 = vpop.xlane.xlu2 %1099 }
 0x1a6   : > { %v3057_v37 = vadd.f32 %v995_v33, %v904_v29 }
 0x1a8   : > { %v2285_v24 = vpop.eup %2284  ;;  %3804 = vst [vmem:[#allocation22_spill] sm:$0xff] %v3057_v37 }
 0x1a9   : > { %v1285_v1 = vmul.f32 %v2285_v24, %v1232_v42  ;;  %vm1291_vm0 = vweird.f32 %v2285_v24  ;;  %v1017_v42 = vpop.xlane.xlu0 %1016 }
 0x1aa   : > { %vm1292_vm2 = vmor %vm1290_vm1, %vm1291_vm0 }
 0x1ab   : > { %v1286_v6 = vmul.f32 %v2285_v24, %v1285_v1  ;;  %v3077_v1 = vmul.f32 0.020408163, %v1017_v42 }
 0x1ad   : > { %v1287_v18 = vmul.f32 0.5, %v1286_v6  ;;  %v1185_v11 = vmul.f32 %v3077_v1, %v3077_v1 }
 0x1af   : > { %v1288_v32 = vsub.f32 1.5, %v1287_v18  ;;  %v3081_v18 = vmul.f32 0.020408163, %v1021_v53 }
 0x1b1   : > { %v1289_v58 = vmul.f32 %v2285_v24, %v1288_v32 }
 0x1b3   : > { %1117 = vadd.xlane.f32.xlu2 %v1073_v47  ;;  %v1293_v41 = vsel %vm1292_vm2, %v2285_v24, %v1289_v58  ;;  %v1533_v47 = vmul.f32 %v3060_v39, %v1303_v10  ;;  %v1096_v24 = vpop.xlane.xlu0 %1095  ;;  %v1187_v58 = vmul.f32 %v3081_v18, %v3081_v18 }
 0x1b4   : > { %v1532_v48 = vmul.f32 %v3064_v44, %v1293_v41 }
 0x1b5   : > { %v1558_v20 = vmul.f32 %v1533_v47, %v3034_v14 }
 0x1b6   : > { %v1557_v46 = vmul.f32 %v1532_v48, %v3039_v23  ;;  %v1161_v23 = vmul.f32 0.020408163, %v1094_v49  ;;  %v906_v28 = vpop.f32.mrf.mxu2 }
 0x1b8   : > { %1119 = vadd.xlane.f32.xlu0 %v1074_v52  ;;  %v1092_v52 = vpop.xlane.xlu1 %1091  ;;  %v722_v6 = vpop.f32.mrf.mxu0 }
 0x1b9   : > { %v1160_v12 = vmul.f32 0.020408163, %v1092_v52 }
 0x1ba   : > { %v814_v7 = vpop.f32.mrf.mxu1  ;;  %v998_v10 = vpop.f32.mrf.mxu3 }
 0x1bb   : > { %1044 = vadd.xlane.f32.xlu2 %v3045_v30  ;;  %v1023_v3 = vpop.xlane.xlu0 %1022  ;;  %v1210_v32 = vsub.f32 %v1160_v12, %v1185_v11  ;;  %v3181_v30 = vld [vmem:[%s3004_s25 + $0x38] sm:$0xff] }
 0x1c0   : > { %1046 = vadd.xlane.f32.xlu0 %v3052_v4  ;;  %v1019_v55 = vpop.xlane.xlu1 %1018 }
 0x1c1   : > { %v3073_v60 = vmul.f32 0.020408163, %v1019_v55 }
 0x1c3   : > { %v1186_v0 = vmul.f32 %v3073_v60, %v3073_v60  ;;  %v1102_v33 = vpop.xlane.xlu0 %1101 }
 0x1c5   : > { %1121 = vadd.xlane.f32.xlu1 %v1075_v2  ;;  %v1211_v57 = vsub.f32 %v1161_v23, %v1186_v0  ;;  %v815_v2 = vadd.f32 %v814_v7, %v722_v6  ;;  %v3101_v7 = vmul.f32 0.020408163, %v1023_v3 }
 0x1c7   : > { %v3083_v29 = vadd.f32 1e-05, %v1211_v57  ;;  %v907_v34 = vadd.f32 %v906_v28, %v815_v2  ;;  %v1164_v57 = vmul.f32 0.020408163, %v1100_v56  ;;  %v1188_v3 = vmul.f32 %v3101_v7, %v3101_v7 }
 0x1c8   : > { %v1098_v14 = vpop.xlane.xlu1 %1097 }
 0x1c9   : > { %2286 = vrsqrt.f32 %v3083_v29  ;;  %v3092_v52 = vadd.f32 %v998_v10, %v907_v34  ;;  %vm1330_vm4 = vweird.f32 %v3083_v29 }
 0x1cb   : > { %3805 = vst [vmem:[#allocation23_spill] sm:$0xff] %v3092_v52  ;;  %v1077_v11 = vmul.f32 %v3092_v52, %v3092_v52 }
 0x1cd   : > { %1048 = vadd.xlane.f32.xlu1 %v3057_v37 }
 0x1cf   : > { %v3099_v6 = vpop.eup %2286 }
 0x1d0   : > { %v1025_v22 = vpop.xlane.xlu1 %1024  ;;  %v909_v23 = vpop.f32.mrf.mxu2  ;;  %vm1331_vm3 = vweird.f32 %v3099_v6 }
 0x1d1   : > { %v3088_v41 = vmul.f32 0.020408163, %v1025_v22  ;;  %v1029_v22 = vpop.xlane.xlu0 %1028  ;;  %vm3163_vm5 = vmor %vm1330_vm4, %vm1331_vm3 }
 0x1d3   : > { %1721 = vperm.xlu2 %2253, %v1532_v48   ;;  %v3090_v48 = vadd.f32 1e-05, %v1210_v32  ;;  %v1189_v55 = vmul.f32 %v3088_v41, %v3088_v41  ;;  %v1325_v32 = vmul.f32 %v3099_v6, %v3083_v29 }
 0x1d4   : > { %1612 = vrot.lane.b32.xlu0 %v1558_v20, %s2463_s30  ;;  %v1162_v20 = vmul.f32 0.020408163, %v1096_v24  ;;  %v725_v49 = vpop.f32.mrf.mxu0  ;;  %v1076_v24 = vmul.f32 %v3057_v37, %v3057_v37 }
 0x1d5   : > { %2288 = vrsqrt.f32 %v3090_v48  ;;  %v1214_v12 = vsub.f32 %v1164_v57, %v1189_v55  ;;  %vm1320_vm7 = vweird.f32 %v3090_v48 }
 0x1d6   : > { %v1212_v42 = vsub.f32 %v1162_v20, %v1187_v58  ;;  %v1163_v20 = vmul.f32 0.020408163, %v1098_v14 }
 0x1d7   : > { %v1001_v34 = vpop.f32.mrf.mxu3 }
 0x1d8   : > { %v3094_v53 = vpop.xlane.xlu1 %1103  ;;  %v3107_v2 = vadd.f32 1e-05, %v1212_v42  ;;  %v1326_v42 = vmul.f32 %v3099_v6, %v1325_v32 }
 0x1da   : > { %2290 = vrsqrt.f32 %v3107_v2  ;;  %vm1340_vm10 = vweird.f32 %v3107_v2 }
 0x1db   : > { %1610 = vrot.lane.b32.xlu2 %v1557_v46, %s2463_s30  ;;  %v817_v46 = vpop.f32.mrf.mxu1  ;;  %v3113_v58 = vpop.eup %2288 }
 0x1dc   : > { %1731 = vperm.xlu0 %2252, %v3031_v13   ;;  %v1027_v13 = vpop.xlane.xlu2 %1026  ;;  %v818_v0 = vadd.f32 %v817_v46, %v725_v49  ;;  %v3118_v49 = vadd.f32 1e-05, %v1214_v12  ;;  %v1327_v12 = vmul.f32 0.5, %v1326_v42  ;;  %vm1321_vm6 = vweird.f32 %v3113_v58 }
 0x1dd   : > { %v3116_v10 = vmul.f32 0.020408163, %v1027_v13  ;;  %v1108_v13 = vpop.xlane.xlu0 %1107  ;;  %vm3196_vm8 = vmor %vm1320_vm7, %vm1321_vm6 }
 0x1de   : > { %v910_v28 = vadd.f32 %v909_v23, %v818_v0  ;;  %v1213_v0 = vsub.f32 %v1163_v20, %v1188_v3  ;;  %v1315_v23 = vmul.f32 %v3113_v58, %v3090_v48  ;;  %2292 = vrsqrt.f32 %v3118_v49 }
 0x1df   : > { %v1190_v57 = vmul.f32 %v3116_v10, %v3116_v10  ;;  %v1328_v4 = vsub.f32 1.5, %v1327_v12  ;;  %vm1360_vm13 = vweird.f32 %v3118_v49 }
 0x1e0   : > { %v3120_v46 = vadd.f32 %v1001_v34, %v910_v28  ;;  %v1031_v55 = vpop.xlane.xlu1 %1030  ;;  %v1165_v28 = vmul.f32 0.020408163, %v1102_v33  ;;  %v3135_v32 = vadd.f32 1e-05, %v1213_v0  ;;  %v1316_v3 = vmul.f32 %v3113_v58, %v1315_v23 }
 0x1e2   : > { %3806 = vst [vmem:[#allocation24_spill] sm:$0xff] %v3120_v46  ;;  %v1078_v14 = vmul.f32 %v3120_v46, %v3120_v46  ;;  %v1215_v20 = vsub.f32 %v1165_v28, %v1190_v57  ;;  %2294 = vrsqrt.f32 %v3135_v32  ;;  %v1317_v42 = vmul.f32 0.5, %v1316_v3 }
 0x1e3   : > { %vm1350_vm0 = vweird.f32 %v3135_v32 }
 0x1e4   : > { %v3148_v0 = vadd.f32 1e-05, %v1215_v20 }
 0x1e5   : > { %v1035_v12 = vpop.xlane.xlu0 %1034 }
 0x1e6   : > { %1726 = vperm.xlu1 %2254, %v1533_v47   ;;  %v1106_v47 = vpop.xlane.xlu2 %1105  ;;  %2296 = vrsqrt.f32 %v3148_v0  ;;  %vm1370_vm3 = vweird.f32 %v3148_v0 }
 0x1e7   : > { %v1167_v33 = vmul.f32 0.020408163, %v1106_v47 }
 0x1ee   : > { %v1033_v56 = vpop.xlane.xlu2 %1032 }
 0x1f6   : > { %v3137_v34 = vpop.xlane.xlu2 %1111 }
 0x204   : > { %1123 = vadd.xlane.f32.xlu2 %v1076_v24  ;;  %v3128_v24 = vmul.f32 0.020408163, %v1031_v55 }
 0x206   : > { %1125 = vadd.xlane.f32.xlu0 %v1077_v11  ;;  %v3133_v11 = vpop.eup %2290  ;;  %v1192_v38 = vmul.f32 %v3128_v24, %v3128_v24 }
 0x207   : > { %v1335_v55 = vmul.f32 %v3133_v11, %v3107_v2  ;;  %v3145_v37 = vpop.eup %2292  ;;  %vm1341_vm9 = vweird.f32 %v3133_v11 }
 0x208   : > { %v1217_v57 = vsub.f32 %v1167_v33, %v1192_v38  ;;  %v1355_v28 = vmul.f32 %v3145_v37, %v3118_v49  ;;  %v3173_v33 = vpop.xlane.xlu2 %1038  ;;  %vm3227_vm11 = vmor %vm1340_vm10, %vm1341_vm9  ;;  %vm1361_vm12 = vweird.f32 %v3145_v37 }
 0x209   : > { %v1336_v23 = vmul.f32 %v3133_v11, %v1335_v55  ;;  %v3171_v55 = vpop.xlane.xlu1 %1109  ;;  %vm3252_vm14 = vmor %vm1360_vm13, %vm1361_vm12 }
 0x20a   : > { %v3167_v20 = vadd.f32 1e-05, %v1217_v57  ;;  %v1356_v29 = vmul.f32 %v3145_v37, %v1355_v28  ;;  %v1169_v9 = vmul.f32 0.020408163, %v3171_v55 }
 0x20b   : > { %v1337_v3 = vmul.f32 0.5, %v1336_v23 }
 0x20c   : > { %1050 = vadd.xlane.f32.xlu2 %v3092_v52  ;;  %v1318_v52 = vsub.f32 1.5, %v1317_v42  ;;  %v1166_v42 = vmul.f32 0.020408163, %v3094_v53  ;;  %2298 = vrsqrt.f32 %v3167_v20  ;;  %vm1390_vm6 = vweird.f32 %v3167_v20 }
 0x20d   : > { %v1338_v51 = vsub.f32 1.5, %v1337_v3 }
 0x20e   : > { %1052 = vadd.xlane.f32.xlu0 %v3120_v46  ;;  %v3150_v46 = vmul.f32 0.020408163, %v1029_v22  ;;  %v3161_v22 = vpop.eup %2294  ;;  %v1319_v57 = vmul.f32 %v3113_v58, %v1318_v52  ;;  %v1168_v52 = vmul.f32 0.020408163, %v1108_v13  ;;  %v3214_v13 = vld [vmem:[%s3004_s25 + $0x30] sm:$0xff] }
 0x20f   : > { %v1339_v21 = vmul.f32 %v3133_v11, %v1338_v51  ;;  %vm1351_vm15 = vweird.f32 %v3161_v22 }
 0x210   : > { %1127 = vadd.xlane.f32.xlu1 %v1078_v14  ;;  %v1329_v14 = vmul.f32 %v3099_v6, %v1328_v4  ;;  %v1191_v47 = vmul.f32 %v3150_v46, %v3150_v46  ;;  %v3169_v4 = vmul.f32 0.020408163, %v1033_v56  ;;  %v1345_v56 = vmul.f32 %v3161_v22, %v3135_v32  ;;  %vm3290_vm1 = vmor %vm1350_vm0, %vm1351_vm15 }
 0x212   : > { %v1333_v62 = vsel %vm3163_vm5, %v3099_v6, %v1329_v14  ;;  %v1216_v23 = vsub.f32 %v1166_v42, %v1191_v47  ;;  %v1193_v53 = vmul.f32 %v3169_v4, %v3169_v4  ;;  %v3193_v6 = vpop.eup %2296  ;;  %v1357_v14 = vmul.f32 0.5, %v1356_v29  ;;  %v3200_v47 = vpop.xlane.xlu0 %1113 }
 0x213   : > { %v3191_v28 = vmul.f32 %v3181_v30, %v1333_v62  ;;  %v1346_v3 = vmul.f32 %v3161_v22, %v1345_v56  ;;  %v1323_v62 = vsel %vm3196_vm8, %v3113_v58, %v1319_v57  ;;  %v1365_v48 = vmul.f32 %v3193_v6, %v3148_v0  ;;  %v1037_v58 = vpop.xlane.xlu1 %1036  ;;  %v3220_v57 = vpop.permute.xlu2 %1604 }
 0x214   : > { %v3203_v42 = vadd.f32 1e-05, %v1216_v23  ;;  %v1218_v29 = vsub.f32 %v1168_v52, %v1193_v53  ;;  %v1358_v56 = vsub.f32 1.5, %v1357_v14  ;;  %v3217_v23 = vpop.eup %2298  ;;  %v3242_v52 = vmul.f32 0.020408163, %v1037_v58 }
 0x215   : > { %v1561_v35 = vmul.f32 %v3191_v28, %v3073_v60  ;;  %v1347_v38 = vmul.f32 0.5, %v1346_v3  ;;  %v1535_v60 = vmul.f32 %v3214_v13, %v1323_v62  ;;  %v1366_v53 = vmul.f32 %v3193_v6, %v1365_v48  ;;  %v3245_v3 = vld [vmem:[%s3004_s25 + $0x40] sm:$0xff] }
 0x216   : > { %2300 = vrsqrt.f32 %v3203_v42  ;;  %v3232_v14 = vadd.f32 1e-05, %v1218_v29  ;;  %v1385_v2 = vmul.f32 %v3217_v23, %v3167_v20  ;;  %v1359_v62 = vmul.f32 %v3145_v37, %v1358_v56  ;;  %v3350_v20 = vld [vmem:[%s3004_s25 + $0x68] sm:$0xff] }
 0x217   : > { %v1348_v48 = vsub.f32 1.5, %v1347_v38  ;;  %v1560_v29 = vmul.f32 %v1535_v60, %v3077_v1  ;;  %v1195_v49 = vmul.f32 %v3242_v52, %v3242_v52  ;;  %vm1371_vm2 = vweird.f32 %v3193_v6 }
 0x218   : > { %2302 = vrsqrt.f32 %v3232_v14  ;;  %v1386_v56 = vmul.f32 %v3217_v23, %v1385_v2  ;;  %v1363_v1 = vsel %vm3252_vm14, %v3145_v37, %v1359_v62  ;;  %vm3321_vm4 = vmor %vm1370_vm3, %vm1371_vm2  ;;  %vm1391_vm5 = vweird.f32 %v3217_v23 }
 0x219   : > { %v1349_v2 = vmul.f32 %v3161_v22, %v1348_v48  ;;  %vm1392_vm7 = vmor %vm1390_vm6, %vm1391_vm5  ;;  %vm1380_vm9 = vweird.f32 %v3203_v42  ;;  %vm1400_vm12 = vweird.f32 %v3232_v14 }
 0x21a   : > { %v3257_v58 = vpop.xlane.xlu0 %1040  ;;  %v1387_v36 = vmul.f32 0.5, %v1386_v56 }
 0x21b   : > { %v3272_v38 = vpop.xlane.xlu1 %1115  ;;  %v3281_v37 = vpop.permute.xlu2 %1711 }
 0x21c   : > { %v3260_v17 = vpop.eup %2300 }
 0x21d   : > { %vm1381_vm8 = vweird.f32 %v3260_v17 }
 0x21e   : > { %v3288_v8 = vpop.eup %2302  ;;  %vm3368_vm10 = vmor %vm1380_vm9, %vm1381_vm8 }
 0x222   : > { %1618 = vrot.lane.b32.xlu0 %v1561_v35, %s2463_s30  ;;  %v1343_v35 = vsel %vm3227_vm11, %v3133_v11, %v1339_v21  ;;  %v1367_v11 = vmul.f32 0.5, %v1366_v53  ;;  %v1375_v21 = vmul.f32 %v3260_v17, %v3203_v42  ;;  %v3301_v32 = vpop.permute.xlu0 %1706  ;;  %vm1401_vm11 = vweird.f32 %v3288_v8 }
 0x223   : > { %v1537_v51 = vmul.f32 %v3245_v3, %v1343_v35  ;;  %v1170_v35 = vmul.f32 0.020408163, %v3137_v34  ;;  %vm1402_vm13 = vmor %vm1400_vm12, %vm1401_vm11 }
 0x224   : > { %1614 = vrot.lane.b32.xlu2 %v3037_v16, %s2463_s30  ;;  %v3249_v16 = vmul.f32 0.020408163, %v1035_v12  ;;  %v3270_v12 = vld [vmem:[%s3004_s25 + $0x50] sm:$0xff] }
 0x225   : > { %v3284_v62 = vmul.f32 %v3270_v12, %v1363_v1  ;;  %v1220_v50 = vsub.f32 %v1170_v35, %v1195_v49  ;;  %v1376_v1 = vmul.f32 %v3260_v17, %v1375_v21  ;;  %v1388_v49 = vsub.f32 1.5, %v1387_v36 }
 0x226   : > { %v1194_v53 = vmul.f32 %v3249_v16, %v3249_v16 }
 0x227   : > { %v1564_v55 = vmul.f32 %v3284_v62, %v3088_v41  ;;  %v1562_v41 = vmul.f32 %v1537_v51, %v3081_v18  ;;  %v1389_v21 = vmul.f32 %v3217_v23, %v1388_v49 }
 0x228   : > { %v1219_v48 = vsub.f32 %v1169_v9, %v1194_v53  ;;  %v1395_v9 = vmul.f32 %v3288_v8, %v3232_v14  ;;  %v3309_v53 = vadd.f32 1e-05, %v1220_v50  ;;  %v1377_v50 = vmul.f32 0.5, %v1376_v1 }
 0x229   : > { %1616 = vrot.lane.b32.xlu1 %v1560_v29, %s2463_s30  ;;  %v1368_v29 = vsub.f32 1.5, %v1367_v11  ;;  %v3298_v11 = vld [vmem:[%s3004_s25 + $0x48] sm:$0xff] }
 0x22a   : > { %1746 = vperm.xlu0 %2252, %v1537_v51   ;;  %v3319_v36 = vadd.f32 1e-05, %v1219_v48  ;;  %v1396_v18 = vmul.f32 %v3288_v8, %v1395_v9  ;;  %2304 = vrsqrt.f32 %v3309_v53  ;;  %v3352_v49 = vpop.permute.xlu0 %1606  ;;  %vm1420_vm15 = vweird.f32 %v3309_v53 }
 0x22b   : > { %v1369_v56 = vmul.f32 %v3193_v6, %v1368_v29  ;;  %v3335_v29 = vld [vmem:[%s3004_s25 + $0x58] sm:$0xff] }
 0x22c   : > { %1736 = vperm.xlu2 %2253, %v1535_v60   ;;  %v1353_v60 = vsel %vm3290_vm1, %v3161_v22, %v1349_v2  ;;  %v3312_v22 = vmul.f32 0.020408163, %v3173_v33  ;;  %v1043_v33 = vpop.xlane.xlu1 %1042  ;;  %2306 = vrsqrt.f32 %v3319_v36  ;;  %vm1410_vm2 = vweird.f32 %v3319_v36 }
 0x22d   : > { %v1538_v35 = vmul.f32 %v3298_v11, %v1353_v60  ;;  %v1373_v0 = vsel %vm3321_vm4, %v3193_v6, %v1369_v56  ;;  %v1171_v6 = vmul.f32 0.020408163, %v3200_v47  ;;  %v3342_v48 = vmul.f32 0.020408163, %v1043_v33 }
 0x22e   : > { %v1196_v51 = vmul.f32 %v3312_v22, %v3312_v22  ;;  %v1378_v60 = vsub.f32 1.5, %v1377_v50  ;;  %v1540_v1 = vmul.f32 %v3335_v29, %v1373_v0 }
 0x22f   : > { %v1563_v34 = vmul.f32 %v1538_v35, %v3101_v7  ;;  %v1393_v7 = vsel %vm1392_vm7, %v3217_v23, %v1389_v21 }
 0x230   : > { %v1221_v56 = vsub.f32 %v1171_v6, %v1196_v51  ;;  %v3354_v47 = vpop.eup %2304  ;;  %v1542_v2 = vmul.f32 %v3350_v20, %v1393_v7  ;;  %v1379_v50 = vmul.f32 %v3260_v17, %v1378_v60  ;;  %v3379_v60 = vld [vmem:[%s3004_s25 + $0x60] sm:$0xff]  ;;  %v3394_v7 = vmul.f32 0.020408163, %v3257_v58 }
 0x231   : > { %1741 = vperm.xlu1 %2254, %v3191_v28   ;;  %v1118_v28 = vpop.xlane.xlu2 %1117  ;;  %vm1421_vm14 = vweird.f32 %v3354_v47 }
 0x232   : > { %1624 = vrot.lane.b32.xlu0 %v1564_v55, %s2463_s30  ;;  %v1397_v55 = vmul.f32 0.5, %v1396_v18  ;;  %v1173_v9 = vmul.f32 0.020408163, %v1118_v28  ;;  %v3361_v33 = vpop.eup %2306  ;;  %v3363_v28 = vadd.f32 1e-05, %v1221_v56  ;;  %v1415_v18 = vmul.f32 %v3354_v47, %v3309_v53  ;;  %vm3432_vm0 = vmor %vm1420_vm15, %vm1421_vm14 }
 0x233   : > { %v1383_v6 = vsel %vm3368_vm10, %v3260_v17, %v1379_v50  ;;  %v1565_v17 = vmul.f32 %v1540_v1, %v3116_v10  ;;  %vm1411_vm1 = vweird.f32 %v3361_v33 }
 0x234   : > { %1620 = vrot.lane.b32.xlu2 %v1562_v41, %s2463_s30  ;;  %v1198_v41 = vmul.f32 %v3342_v48, %v3342_v48  ;;  %v1398_v23 = vsub.f32 1.5, %v1397_v55  ;;  %2308 = vrsqrt.f32 %v3363_v28  ;;  %vm1412_vm3 = vmor %vm1410_vm2, %vm1411_vm1  ;;  %vm1430_vm5 = vweird.f32 %v3363_v28 }
 0x236   : > { %v1223_v0 = vsub.f32 %v1173_v9, %v1198_v41  ;;  %v1399_v56 = vmul.f32 %v3288_v8, %v1398_v23  ;;  %v1120_v9 = vpop.xlane.xlu0 %1119  ;;  %v1541_v41 = vmul.f32 %v3379_v60, %v1383_v6 }
 0x237   : > { %v1174_v10 = vmul.f32 0.020408163, %v1120_v9  ;;  %v3420_v9 = vpop.permute.xlu1 %1716 }
 0x238   : > { %v3383_v42 = vadd.f32 1e-05, %v1223_v0  ;;  %v1403_v14 = vsel %vm1402_vm13, %v3288_v8, %v1399_v56  ;;  %v1197_v0 = vmul.f32 %v3394_v7, %v3394_v7 }
 0x239   : > { %1622 = vrot.lane.b32.xlu1 %v1563_v34, %s2463_s30  ;;  %v1045_v51 = vpop.xlane.xlu2 %1044  ;;  %v1567_v34 = vmul.f32 %v1542_v2, %v3128_v24  ;;  %v1416_v24 = vmul.f32 %v3354_v47, %v1415_v18  ;;  %v1566_v18 = vmul.f32 %v1541_v41, %v3150_v46 }
 0x23a   : > { %1761 = vperm.xlu0 %2252, %v1540_v1   ;;  %v3385_v55 = vmul.f32 0.020408163, %v1045_v51  ;;  %2310 = vrsqrt.f32 %v3383_v42  ;;  %v3406_v1 = vld [vmem:[%s3004_s25 + $0x70] sm:$0xff]  ;;  %v3408_v23 = vpop.eup %2308  ;;  %vm1450_vm8 = vweird.f32 %v3383_v42 }
 0x23b   : > { %v1417_v58 = vmul.f32 0.5, %v1416_v24  ;;  %v1543_v51 = vmul.f32 %v3406_v1, %v1403_v14  ;;  %v1425_v8 = vmul.f32 %v3408_v23, %v3363_v28  ;;  %vm1431_vm4 = vweird.f32 %v3408_v23 }
 0x23c   : > { %1751 = vperm.xlu2 %2253, %v1538_v35   ;;  %v1405_v35 = vmul.f32 %v3361_v33, %v3319_v36  ;;  %vm1432_vm6 = vmor %vm1430_vm5, %vm1431_vm4 }
 0x23d   : > { %v1418_v6 = vsub.f32 1.5, %v1417_v58  ;;  %v1568_v58 = vmul.f32 %v1543_v51, %v3169_v4 }
 0x23e   : > { %v1406_v50 = vmul.f32 %v3361_v33, %v1405_v35  ;;  %v1172_v35 = vmul.f32 0.020408163, %v3272_v38  ;;  %v1426_v38 = vmul.f32 %v3408_v23, %v1425_v8  ;;  %v1679_v8 = vsub.f32 %v3011_v25, %v3220_v57  ;;  %v1047_v36 = vpop.xlane.xlu0 %1046 }
 0x23f   : > { %v1609_v4 = vpop.permute.xlu1 %1608  ;;  %v3475_v57 = vmul.f32 0.020408163, %v1047_v36 }
 0x240   : > { %v1407_v21 = vmul.f32 0.5, %v1406_v50  ;;  %v3418_v56 = vpop.eup %2310  ;;  %v1222_v24 = vsub.f32 %v1172_v35, %v1197_v0  ;;  %v1427_v0 = vmul.f32 0.5, %v1426_v38  ;;  %v3447_v35 = vld [vmem:[%s3004_s25 + $0x80] sm:$0xff] }
 0x241   : > { %1756 = vperm.xlu1 %2254, %v3284_v62   ;;  %v1199_v62 = vmul.f32 %v3385_v55, %v3385_v55  ;;  %v1445_v50 = vmul.f32 %v3418_v56, %v3383_v42  ;;  %vm1451_vm7 = vweird.f32 %v3418_v56  ;;  %v3498_v36 = vpop.permute.xlu2 %1721 }
 0x242   : > { %1630 = vrot.lane.b32.xlu0 %v1567_v34, %s2463_s30  ;;  %v1408_v46 = vsub.f32 1.5, %v1407_v21  ;;  %v2464_v21 = vmov 1   ;;  %vm1452_vm9 = vmor %vm1450_vm8, %vm1451_vm7 }
 0x243   : > { %v1224_v34 = vsub.f32 %v1174_v10, %v1199_v62  ;;  %v1419_v62 = vmul.f32 %v3354_v47, %v1418_v6  ;;  %v3429_v10 = vadd.f32 1e-05, %v1222_v24 }
 0x244   : > { %1626 = vrot.lane.b32.xlu2 %v1565_v17, %s2463_s30 }
 0x245   : > { %v3422_v17 = vadd.f32 1e-05, %v1224_v34  ;;  %v1423_v53 = vsel %vm3432_vm0, %v3354_v47, %v1419_v62  ;;  %v3456_v47 = vld [vmem:[%s3004_s25 + $0x78] sm:$0xff]  ;;  %vm1440_vm14 = vweird.f32 %v3429_v10 }
 0x247   : > { %2312 = vrsqrt.f32 %v3422_v17  ;;  %v1122_v14 = vpop.xlane.xlu1 %1121  ;;  %vm1460_vm11 = vweird.f32 %v3422_v17 }
 0x248   : > { %2314 = vrsqrt.f32 %v3429_v10 }
 0x249   : > { %1628 = vrot.lane.b32.xlu1 %v1566_v18, %s2463_s30  ;;  %v1446_v18 = vmul.f32 %v3418_v56, %v1445_v50 }
 0x24a   : > { %1776 = vperm.xlu0 %2252, %v1543_v51  }
 0x24b   : > { %v1447_v51 = vmul.f32 0.5, %v1446_v18 }
 0x24c   : > { %1766 = vperm.xlu2 %2253, %v1541_v41   ;;  %v1680_v41 = vsub.f32 %v3019_v45, %v3352_v49  ;;  %v1409_v45 = vmul.f32 %v3361_v33, %v1408_v46  ;;  %v1545_v49 = vmul.f32 %v3447_v35, %v1423_v53 }
 0x24d   : > { %v3458_v6 = vpop.eup %2312  ;;  %v1448_v50 = vsub.f32 1.5, %v1447_v51 }
 0x24e   : > { %v1413_v34 = vsel %vm1412_vm3, %v3361_v33, %v1409_v45  ;;  %v3462_v24 = vpop.eup %2314  ;;  %v1570_v46 = vmul.f32 %v1545_v49, %v3242_v52  ;;  %v1455_v33 = vmul.f32 %v3458_v6, %v3422_v17  ;;  %v3823_v52 = vmov 0   ;;  %v3522_v17 = vld [vmem:[%s3004_s25 + $0x90] sm:$0xff] }
 0x24f   : > { %v1544_v38 = vmul.f32 %v3456_v47, %v1413_v34  ;;  %v1435_v25 = vmul.f32 %v3462_v24, %v3429_v10  ;;  %v1449_v28 = vmul.f32 %v3418_v56, %v1448_v50  ;;  %v1200_v45 = vmul.f32 %v3475_v57, %v3475_v57 }
 0x250   : > { %vm1461_vm10 = vweird.f32 %v3458_v6  ;;  %vm1441_vm12 = vweird.f32 %v3462_v24 }
 0x251   : > { %1771 = vperm.xlu1 %2254, %v1542_v2   ;;  %v1428_v2 = vsub.f32 1.5, %v1427_v0  ;;  %v3482_v0 = vld [vmem:[%s3004_s25 + $0x88] sm:$0xff]  ;;  %v1569_v18 = vmul.f32 %v1544_v38, %v3249_v16  ;;  %v1436_v53 = vmul.f32 %v3462_v24, %v1435_v25  ;;  %v1681_v16 = vsub.f32 %v3025_v59, %v1609_v4  ;;  %vm1462_vm13 = vmor %vm1460_vm11, %vm1461_vm10 }
 0x252   : > { %2256 = vset.pattern.permute.xlu0 %v2464_v21  ;;  %vm1442_vm15 = vmor %vm1440_vm14, %vm1441_vm12 }
 0x253   : > { %1861 = vperm.xlu0 %2256, %v1680_v41   ;;  %v1429_v62 = vmul.f32 %v3408_v23, %v1428_v2  ;;  %v1456_v41 = vmul.f32 %v3458_v6, %v1455_v33  ;;  %v1175_v2 = vmul.f32 0.020408163, %v1122_v14  ;;  %v1437_v42 = vmul.f32 0.5, %v1436_v53  ;;  %v1613_v33 = vpop.permute.xlu0 %1612 }
 0x254   : > { %1632 = vrot.lane.b32.xlu2 %v1568_v58, %s2463_s30 }
 0x255   : > { %v1433_v58 = vsel %vm1432_vm6, %v3408_v23, %v1429_v62  ;;  %v1457_v34 = vmul.f32 0.5, %v1456_v41  ;;  %v1453_v23 = vsel %vm1452_vm9, %v3418_v56, %v1449_v28  ;;  %v1438_v62 = vsub.f32 1.5, %v1437_v42  ;;  %v3517_v41 = vld [vmem:[%s3004_s25 + $0xa0] sm:$0xff]  ;;  %v1049_v28 = vpop.xlane.xlu1 %1048 }
 0x256   : > { %v1546_v51 = vmul.f32 %v3482_v0, %v1433_v58 }
 0x257   : > { %v1458_v50 = vsub.f32 1.5, %v1457_v34  ;;  %v1439_v14 = vmul.f32 %v3462_v24, %v1438_v62 }
 0x258   : > { %v1571_v25 = vmul.f32 %v1546_v51, %v3312_v22 }
 0x259   : > { %2255 = vset.pattern.permute.xlu1 %v2464_v21  ;;  %v1459_v4 = vmul.f32 %v3458_v6, %v1458_v50  ;;  %v1443_v22 = vsel %vm1442_vm15, %v3462_v24, %v1439_v14  ;;  %v1683_v50 = vsub.f32 %v3060_v39, %v1613_v33 }
 0x25a   : > { %1856 = vperm.xlu1 %2255, %v1679_v8   ;;  %v3494_v8 = vld [vmem:[%s3004_s25 + $0x98] sm:$0xff] }
 0x25b   : > { %1636 = vrot.lane.b32.xlu0 %v1570_v46, %s2463_s30  ;;  %v1225_v46 = vsub.f32 %v1175_v2, %v1200_v45  ;;  %v3530_v45 = vmul.f32 0.020408163, %v1049_v28 }
 0x25c   : > { %1781 = vperm.xlu2 %2253, %v1544_v38   ;;  %2259 = vset.pattern.permute.xlu0 %v3823_v52  ;;  %v1548_v38 = vmul.f32 %v3494_v8, %v1453_v23 }
 0x25d   : > { %v3502_v56 = vadd.f32 1e-05, %v1225_v46  ;;  %v3536_v46 = vpop.permute.xlu1 %1726 }
 0x25e   : > { %v1573_v59 = vmul.f32 %v1548_v38, %v3342_v48  ;;  %v1611_v48 = vpop.permute.xlu2 %1610 }
 0x25f   : > { %2316 = vrsqrt.f32 %v3502_v56  ;;  %v1682_v58 = vsub.f32 %v3064_v44, %v1611_v48  ;;  %v1201_v44 = vmul.f32 %v3530_v45, %v3530_v45  ;;  %vm1470_vm1 = vweird.f32 %v3502_v56 }
 0x262   : > { %1634 = vrot.lane.b32.xlu1 %v1569_v18, %s2463_s30  ;;  %v3525_v18 = vpop.permute.xlu0 %1731 }
 0x263   : > { %1791 = vperm.xlu0 %2259, %v1546_v51   ;;  %2257 = vset.pattern.permute.xlu1 %v3823_v52 }
 0x264   : > { %2258 = vset.pattern.permute.xlu2 %v2464_v21 }
 0x265   : > { %1866 = vperm.xlu2 %2258, %v1681_v16   ;;  %v2317_v10 = vpop.eup %2316 }
 0x266   : > { %v1465_v24 = vmul.f32 %v2317_v10, %v3502_v56  ;;  %vm1471_vm0 = vweird.f32 %v2317_v10 }
 0x267   : > { %vm1472_vm2 = vmor %vm1470_vm1, %vm1471_vm0 }
 0x268   : > { %v1466_v34 = vmul.f32 %v2317_v10, %v1465_v24 }
 0x26a   : > { %1786 = vperm.xlu1 %2257, %v1545_v49   ;;  %v1463_v49 = vsel %vm1462_vm13, %v3458_v6, %v1459_v4  ;;  %v1547_v6 = vmul.f32 %v3522_v17, %v1443_v22 }
 0x26b   : > { %1642 = vrot.lane.b32.xlu0 %v1573_v59, %s2463_s30  ;;  %v1549_v53 = vmul.f32 %v3517_v41, %v1463_v49  ;;  %v1467_v59 = vmul.f32 0.5, %v1466_v34 }
 0x26c   : > { %v1572_v16 = vmul.f32 %v1547_v6, %v3394_v7 }
 0x26d   : > { %1638 = vrot.lane.b32.xlu2 %v1571_v25, %s2463_s30  ;;  %v1468_v25 = vsub.f32 1.5, %v1467_v59  ;;  %v1574_v24 = vmul.f32 %v1549_v53, %v3385_v55 }
 0x26e   : > { %2261 = vset.pattern.permute.xlu2 %v3823_v52 }
 0x272   : > { %2260 = vset.pattern.permute.xlu1 %v2464_v21 }
 0x273   : > { %1806 = vperm.xlu0 %2259, %v1549_v53   ;;  %1871 = vperm.xlu1 %2260, %v1682_v58   ;;  %v3564_v53 = vld [vmem:[%s3004_s25 + $0xa8] sm:$0xff] }
 0x275   : > { %1796 = vperm.xlu2 %2261, %v1547_v6  }
 0x277   : > { %v1124_v2 = vpop.xlane.xlu2 %1123 }
 0x278   : > { %v1176_v51 = vmul.f32 0.020408163, %v1124_v2 }
 0x279   : > { %v1126_v23 = vpop.xlane.xlu0 %1125 }
 0x27a   : > { %v1226_v42 = vsub.f32 %v1176_v51, %v1201_v44  ;;  %v1177_v48 = vmul.f32 0.020408163, %v1126_v23  ;;  %v1469_v44 = vmul.f32 %v2317_v10, %v1468_v25 }
 0x27b   : > { %1640 = vrot.lane.b32.xlu1 %v1572_v16, %s2463_s30  ;;  %2265 = vset.pattern.permute.xlu0 %v2464_v21 }
 0x27c   : > { %v3541_v62 = vadd.f32 1e-05, %v1226_v42  ;;  %2263 = vset.pattern.permute.xlu1 %v3823_v52  ;;  %v1473_v55 = vsel %vm1472_vm2, %v2317_v10, %v1469_v44  ;;  %v2324_v42 = vld [vmem:[%s3004_s25 + $0x28] sm:$0xff] }
 0x27d   : > { %2262 = vset.pattern.permute.xlu2 %v2464_v21  ;;  %v1550_v56 = vmul.f32 %v3564_v53, %v1473_v55 }
 0x27e   : > { %2318 = vrsqrt.f32 %v3541_v62  ;;  %1876 = vperm.xlu2 %2262, %v1683_v50   ;;  %vm1480_vm4 = vweird.f32 %v3541_v62 }
 0x27f   : > { %v1051_v7 = vpop.xlane.xlu2 %1050 }
 0x280   : > { %v3546_v4 = vmul.f32 0.020408163, %v1051_v7 }
 0x281   : > { %v1053_v14 = vpop.xlane.xlu0 %1052 }
 0x282   : > { %v1202_v49 = vmul.f32 %v3546_v4, %v3546_v4  ;;  %v3550_v39 = vmul.f32 0.020408163, %v1053_v14 }
 0x283   : > { %1801 = vperm.xlu1 %2263, %v1548_v38   ;;  %v1128_v33 = vpop.xlane.xlu1 %1127 }
 0x284   : > { %v3552_v22 = vpop.eup %2318  ;;  %v1227_v58 = vsub.f32 %v1177_v48, %v1202_v49  ;;  %v1203_v28 = vmul.f32 %v3550_v39, %v3550_v39  ;;  %v1178_v6 = vmul.f32 0.020408163, %v1128_v33 }
 0x285   : > { %v1475_v2 = vmul.f32 %v3552_v22, %v3541_v62  ;;  %vm1481_vm3 = vweird.f32 %v3552_v22 }
 0x286   : > { %v1252_v51 = vadd.f32 1e-05, %v1227_v58  ;;  %v1228_v34 = vsub.f32 %v1178_v6, %v1203_v28  ;;  %1644 = vrot.lane.b32.xlu2 %v1574_v24, %s2463_s30  ;;  %v1575_v58 = vmul.f32 %v1550_v56, %v3475_v57  ;;  %vm3579_vm7 = vmor %vm1480_vm4, %vm1481_vm3 }
 0x287   : > { %v1476_v38 = vmul.f32 %v3552_v22, %v1475_v2  ;;  %v1615_v23 = vpop.permute.xlu2 %1614  ;;  %2266 = vset.pattern.permute.xlu2 %v3823_v52 }
 0x288   : > { %2320 = vrsqrt.f32 %v1252_v51  ;;  %v1253_v16 = vadd.f32 1e-05, %v1228_v34  ;;  %v1684_v50 = vsub.f32 %v2324_v42, %v1615_v23  ;;  %vm1490_vm6 = vweird.f32 %v1252_v51  ;;  %v3584_v23 = vld [vmem:[%s3004_s25 + $0xb8] sm:$0xff] }
 0x289   : > { %v1477_v59 = vmul.f32 0.5, %v1476_v38 }
 0x28a   : > { %2322 = vrsqrt.f32 %v1253_v16  ;;  %vm1500_vm10 = vweird.f32 %v1253_v16 }
 0x28b   : > { %2264 = vset.pattern.permute.xlu1 %v2464_v21  ;;  %v1478_v25 = vsub.f32 1.5, %v1477_v59 }
 0x28c   : > { %1881 = vperm.xlu1 %2264, %v1684_v50   ;;  %v3590_v50 = vld [vmem:[%s3004_s25 + $0xb0] sm:$0xff] }
 0x28d   : > { %v1479_v24 = vmul.f32 %v3552_v22, %v1478_v25 }
 0x28e   : > { %v2321_v7 = vpop.eup %2320  ;;  %1811 = vperm.xlu2 %2266, %v1550_v56  }
 0x28f   : > { %v1485_v14 = vmul.f32 %v2321_v7, %v1252_v51  ;;  %v3569_v48 = vpop.permute.xlu2 %1736  ;;  %vm1491_vm5 = vweird.f32 %v2321_v7 }
 0x290   : > { %v2323_v49 = vpop.eup %2322  ;;  %vm1492_vm9 = vmor %vm1490_vm6, %vm1491_vm5 }
 0x291   : > { %v1486_v33 = vmul.f32 %v2321_v7, %v1485_v14  ;;  %v1495_v10 = vmul.f32 %v2323_v49, %v1253_v16  ;;  %vm1501_vm8 = vweird.f32 %v2323_v49 }
 0x292   : > { %vm1502_vm11 = vmor %vm1500_vm10, %vm1501_vm8 }
 0x293   : > { %v1487_v28 = vmul.f32 0.5, %v1486_v33  ;;  %v1496_v6 = vmul.f32 %v2323_v49, %v1495_v10  ;;  %v3596_v10 = vld [vmem:[%s3004_s25 + $0xc0] sm:$0xff] }
 0x294   : > { %v1619_v2 = vpop.permute.xlu0 %1618  ;;  %1646 = vrot.lane.b32.xlu1 %v1575_v58, %s2463_s30 }
 0x295   : > { %v1488_v44 = vsub.f32 1.5, %v1487_v28  ;;  %v1497_v34 = vmul.f32 0.5, %v1496_v6  ;;  %v1686_v38 = vsub.f32 %v3181_v30, %v1619_v2  ;;  %2268 = vset.pattern.permute.xlu1 %v3823_v52  ;;  %v1483_v30 = vsel %vm3579_vm7, %v3552_v22, %v1479_v24 }
 0x296   : > { %2267 = vset.pattern.permute.xlu2 %v2464_v21  ;;  %v1551_v25 = vmul.f32 %v3590_v50, %v1483_v30 }
 0x297   : > { %v1489_v62 = vmul.f32 %v2321_v7, %v1488_v44  ;;  %v1498_v55 = vsub.f32 1.5, %v1497_v34  ;;  %v1621_v42 = vpop.permute.xlu2 %1620  ;;  %1891 = vperm.xlu2 %2267, %v1686_v38  }
 0x298   : > { %v1687_v2 = vsub.f32 %v3245_v3, %v1621_v42 }
 0x299   : > { %v1493_v51 = vsel %vm1492_vm9, %v2321_v7, %v1489_v62  ;;  %v1499_v59 = vmul.f32 %v2323_v49, %v1498_v55 }
 0x29a   : > { %v1552_v56 = vmul.f32 %v3584_v23, %v1493_v51 }
 0x29b   : > { %v1617_v14 = vpop.permute.xlu1 %1616  ;;  %v1503_v33 = vsel %vm1502_vm11, %v2323_v49, %v1499_v59  ;;  %v1831_v59 = vmul.f32 %v3420_v9, %v2855_v43 }
 0x29c   : > { %v1577_v58 = vmul.f32 %v1552_v56, %v3546_v4  ;;  %v1685_v22 = vsub.f32 %v3214_v13, %v1617_v14  ;;  %v3600_v28 = vpop.permute.xlu0 %1746  ;;  %1816 = vperm.xlu1 %2268, %v1551_v25   ;;  %v1553_v16 = vmul.f32 %v3596_v10, %v1503_v33  ;;  %v1576_v13 = vmul.f32 %v1551_v25, %v3530_v45 }
 0x29d   : > { %v1829_v25 = vmul.f32 %v3301_v32, %v2835_v19 }
 0x29e   : > { %1886 = vperm.xlu0 %2265, %v1685_v22   ;;  %v1578_v49 = vmul.f32 %v1553_v16, %v3550_v39 }
 0x29f   : > { %v3603_v7 = vpop.permute.xlu2 %1751  ;;  %1650 = vrot.lane.b32.xlu2 %v1577_v58, %s2463_s30 }
 0x2a0   : > { %2270 = vset.pattern.permute.xlu2 %v3823_v52 }
 0x2a3   : > { %v3608_v6 = vpop.permute.xlu1 %1741 }
 0x2a4   : > { %v1625_v24 = vpop.permute.xlu0 %1624  ;;  %1652 = vrot.lane.b32.xlu1 %v1578_v49, %s2463_s30 }
 0x2a5   : > { %2271 = vset.pattern.permute.xlu1 %v2464_v21  ;;  %v1689_v39 = vsub.f32 %v3270_v12, %v1625_v24 }
 0x2a6   : > { %1648 = vrot.lane.b32.xlu0 %v1576_v13, %s2463_s30 }
 0x2a7   : > { %v1627_v4 = vpop.permute.xlu2 %1626  ;;  %1826 = vperm.xlu2 %2270, %v1553_v16   ;;  %2269 = vset.pattern.permute.xlu0 %v3823_v52 }
 0x2a8   : > { %v1690_v45 = vsub.f32 %v3335_v29, %v1627_v4 }
 0x2ab   : > { %v1623_v44 = vpop.permute.xlu1 %1622 }
 0x2ac   : > { %v3616_v34 = vpop.permute.xlu0 %1761  ;;  %1896 = vperm.xlu1 %2271, %v1687_v2   ;;  %v1688_v3 = vsub.f32 %v3298_v11, %v1623_v44 }
 0x2ae   : > { %1821 = vperm.xlu0 %2269, %v1552_v56  }
 0x2af   : > { %v3619_v38 = vpop.permute.xlu2 %1766  ;;  %2273 = vset.pattern.permute.xlu2 %v2464_v21 }
 0x2b0   : > { %1906 = vperm.xlu2 %2273, %v1689_v39  }
 0x2b3   : > { %v3623_v57 = vpop.permute.xlu1 %1756 }
 0x2b4   : > { %v1631_v52 = vpop.permute.xlu0 %1630  ;;  %1911 = vperm.xlu1 %2271, %v1690_v45  }
 0x2b5   : > { %v1692_v62 = vsub.f32 %v3350_v20, %v1631_v52  ;;  %v1830_v20 = vmul.f32 %v3281_v37, %v2845_v31  ;;  %v1836_v52 = vmul.f32 %v3608_v6, %v2889_v27  ;;  %v1839_v6 = vmul.f32 %v3623_v57, %v2914_v63 }
 0x2b6   : > { %2272 = vset.pattern.permute.xlu0 %v2464_v21 }
 0x2b7   : > { %v1633_v12 = vpop.permute.xlu2 %1632  ;;  %1901 = vperm.xlu0 %2272, %v1688_v3  }
 0x2b8   : > { %1921 = vperm.xlu2 %2273, %v1692_v62   ;;  %v1693_v55 = vsub.f32 %v3406_v1, %v1633_v12 }
 0x2bb   : > { %v1629_v42 = vpop.permute.xlu1 %1628 }
 0x2bc   : > { %v1691_v30 = vsub.f32 %v3379_v60, %v1629_v42  ;;  %v3630_v29 = vpop.permute.xlu0 %1776  ;;  %1926 = vperm.xlu1 %2271, %v1693_v55  }
 0x2bf   : > { %v3632_v51 = vpop.permute.xlu2 %1781  ;;  %1916 = vperm.xlu0 %2272, %v1691_v30  }
 0x2c3   : > { %v3635_v11 = vpop.permute.xlu1 %1771 }
 0x2c5   : > { %v1862_v21 = vpop.permute.xlu0 %1861 }
 0x2c6   : > { %v1980_v1 = vadd.f32 %v1862_v21, %v1830_v20 }
 0x2c7   : > { %v1867_v56 = vpop.permute.xlu2 %1866 }
 0x2c8   : > { %2005 = vst [vmem:[%s3641_s23 + $0x8] sm:$0xff] %v1980_v1  ;;  %v1981_v60 = vadd.f32 %v1867_v56, %v1831_v59 }
 0x2ca   : > { %2006 = vst [vmem:[%s3641_s23 + $0x10] sm:$0xff] %v1981_v60 }
 0x2cc   : > { %v1857_v14 = vpop.permute.xlu1 %1856 }
 0x2cd   : > { %v1979_v33 = vadd.f32 %v1857_v14, %v1829_v25  ;;  %v1637_v31 = vpop.permute.xlu0 %1636 }
 0x2ce   : > { %v1695_v37 = vsub.f32 %v3447_v35, %v1637_v31  ;;  %v1833_v35 = vmul.f32 %v3536_v46, %v2867_v61 }
 0x2cf   : > { %2004 = vst [vmem:[%s3641_s23] sm:$0xff] %v1979_v33  ;;  %v1639_v43 = vpop.permute.xlu2 %1638 }
 0x2d0   : > { %v1696_v9 = vsub.f32 %v3482_v0, %v1639_v43  ;;  %1936 = vperm.xlu2 %2273, %v1695_v37   ;;  %v3827_v37 = vld [vmem:[#allocation11_spill] sm:$0xff]  ;;  %v3828_v43 = vld [vmem:[#allocation16_spill] sm:$0xff] }
 0x2d2   : > { %1941 = vperm.xlu1 %2271, %v1696_v9  }
 0x2d4   : > { %v1635_v58 = vpop.permute.xlu1 %1634 }
 0x2d5   : > { %v1694_v22 = vsub.f32 %v3456_v47, %v1635_v58  ;;  %v3651_v16 = vpop.permute.xlu0 %1791  ;;  %v1832_v47 = vmul.f32 %v3498_v36, %v2864_v54  ;;  %v1834_v36 = vmul.f32 %v3525_v18, %v2872_v5  ;;  %v1835_v18 = vmul.f32 %v3569_v48, %v2879_v15 }
 0x2d6   : > { %v1837_v15 = vmul.f32 %v3600_v28, %v2899_v40 }
 0x2d7   : > { %v3653_v49 = vpop.permute.xlu2 %1796  ;;  %1931 = vperm.xlu0 %2272, %v1694_v22  }
 0x2dc   : > { %v3655_v19 = vpop.permute.xlu1 %1786 }
 0x2dd   : > { %v1643_v32 = vpop.permute.xlu0 %1642  ;;  %v1845_v9 = vmul.f32 %v3655_v19, %v3828_v43 }
 0x2de   : > { %v1698_v24 = vsub.f32 %v3494_v8, %v1643_v32  ;;  %v3829_v32 = vld [vmem:[#allocation14_spill] sm:$0xff] }
 0x2df   : > { %v1877_v0 = vpop.permute.xlu2 %1876 }
 0x2e0   : > { %v1983_v13 = vadd.f32 %v1877_v0, %v1833_v35  ;;  %1951 = vperm.xlu2 %2273, %v1698_v24   ;;  %v3830_v0 = vld [vmem:[#allocation13_spill] sm:$0xff] }
 0x2e2   : > { %2008 = vst [vmem:[%s3641_s23 + $0x20] sm:$0xff] %v1983_v13 }
 0x2e5   : > { %v1872_v4 = vpop.permute.xlu1 %1871  ;;  %v1807_v27 = vpop.permute.xlu0 %1806 }
 0x2e6   : > { %v1982_v2 = vadd.f32 %v1872_v4, %v1832_v47  ;;  %v3831_v47 = vld [vmem:[#allocation19_spill] sm:$0xff] }
 0x2e7   : > { %v1645_v44 = vpop.permute.xlu2 %1644 }
 0x2e8   : > { %2007 = vst [vmem:[%s3641_s23 + $0x18] sm:$0xff] %v1982_v2  ;;  %v1699_v39 = vsub.f32 %v3517_v41, %v1645_v44 }
 0x2ea   : > { %1956 = vperm.xlu1 %2271, %v1699_v39   ;;  %v3832_v39 = vld [vmem:[#allocation17_spill] sm:$0xff] }
 0x2ed   : > { %v1641_v45 = vpop.permute.xlu1 %1640 }
 0x2ee   : > { %v1697_v61 = vsub.f32 %v3522_v17, %v1641_v45 }
 0x2ef   : > { %v3666_v8 = vpop.permute.xlu2 %1811 }
 0x2f0   : > { %1946 = vperm.xlu0 %2272, %v1697_v61  }
 0x2f5   : > { %v1802_v46 = vpop.permute.xlu1 %1801 }
 0x2f6   : > { %v1848_v4 = vmul.f32 %v1802_v46, %v3831_v47 }
 0x2f7   : > { %v1892_v3 = vpop.permute.xlu2 %1891 }
 0x2f8   : > { %v1986_v54 = vadd.f32 %v1892_v3, %v1836_v52  ;;  %v3833_v52 = vld [vmem:[#allocation15_spill] sm:$0xff] }
 0x2fa   : > { %2011 = vst [vmem:[%s3641_s23 + $0x38] sm:$0xff] %v1986_v54 }
 0x2fe   : > { %v1882_v62 = vpop.permute.xlu1 %1881 }
 0x2ff   : > { %v1984_v41 = vadd.f32 %v1882_v62, %v1834_v36  ;;  %v1651_v12 = vpop.permute.xlu2 %1650  ;;  %v3834_v36 = vld [vmem:[#allocation20_spill] sm:$0xff] }
 0x300   : > { %v1702_v55 = vsub.f32 %v3584_v23, %v1651_v12  ;;  %v1849_v46 = vmul.f32 %v1807_v27, %v3834_v36  ;;  %v3835_v12 = vld [vmem:[#allocation18_spill] sm:$0xff] }
 0x301   : > { %2009 = vst [vmem:[%s3641_s23 + $0x28] sm:$0xff] %v1984_v41 }
 0x302   : > { %1971 = vperm.xlu1 %2271, %v1702_v55  }
 0x306   : > { %v1647_v17 = vpop.permute.xlu1 %1646 }
 0x307   : > { %v1700_v42 = vsub.f32 %v3564_v53, %v1647_v17  ;;  %v3676_v30 = vpop.permute.xlu2 %1826  ;;  %v1842_v53 = vmul.f32 %v3635_v11, %v2929_v26  ;;  %v3826_v11 = vld [vmem:[#allocation12_spill] sm:$0xff] }
 0x309   : > { %1961 = vperm.xlu0 %2272, %v1700_v42  }
 0x30e   : > { %v3680_v5 = vpop.permute.xlu1 %1816 }
 0x30f   : > { %v1907_v23 = vpop.permute.xlu2 %1906 }
 0x310   : > { %v1989_v20 = vadd.f32 %v1907_v23, %v1839_v6  ;;  %v1887_v21 = vpop.permute.xlu0 %1886  ;;  %v3837_v6 = vld [vmem:[#allocation22_spill] sm:$0xff] }
 0x311   : > { %v1985_v59 = vadd.f32 %v1887_v21, %v1835_v18  ;;  %v1851_v18 = vmul.f32 %v3680_v5, %v3837_v6  ;;  %v3839_v5 = vld [vmem:[#allocation24_spill] sm:$0xff] }
 0x312   : > { %2014 = vst [vmem:[%s3641_s23 + $0x50] sm:$0xff] %v1989_v20 }
 0x313   : > { %2010 = vst [vmem:[%s3641_s23 + $0x30] sm:$0xff] %v1985_v59  ;;  %v3838_v59 = vld [vmem:[#allocation21_spill] sm:$0xff] }
 0x316   : > { %v1653_v1 = vpop.permute.xlu1 %1652 }
 0x317   : > { %v1703_v56 = vsub.f32 %v3596_v10, %v1653_v1  ;;  %v1922_v63 = vpop.permute.xlu2 %1921  ;;  %v1840_v10 = vmul.f32 %v3616_v34, %v3826_v11  ;;  %v1843_v34 = vmul.f32 %v3630_v29, %v3829_v32  ;;  %v1846_v29 = vmul.f32 %v3651_v16, %v3832_v39 }
 0x318   : > { %v1992_v57 = vadd.f32 %v1922_v63, %v1842_v53  ;;  %v1649_v60 = vpop.permute.xlu0 %1648  ;;  %v1847_v16 = vmul.f32 %v3653_v49, %v3835_v12  ;;  %v1850_v49 = vmul.f32 %v3666_v8, %v3838_v59 }
 0x319   : > { %v1701_v25 = vsub.f32 %v3590_v50, %v1649_v60  ;;  %1976 = vperm.xlu0 %2272, %v1703_v56   ;;  %v1838_v50 = vmul.f32 %v3603_v7, %v3827_v37  ;;  %v1841_v7 = vmul.f32 %v3619_v38, %v3830_v0  ;;  %v1844_v38 = vmul.f32 %v3632_v51, %v3833_v52  ;;  %v3836_v51 = vld [vmem:[#allocation23_spill] sm:$0xff] }
 0x31a   : > { %2017 = vst [vmem:[%s3641_s23 + $0x68] sm:$0xff] %v1992_v57  ;;  %v1853_v56 = vmul.f32 %v3676_v30, %v3839_v5 }
 0x31b   : > { %1966 = vperm.xlu2 %2273, %v1701_v25  }
 0x31e   : > { %v1897_v48 = vpop.permute.xlu1 %1896 }
 0x31f   : > { %v1987_v14 = vadd.f32 %v1897_v48, %v1837_v15 }
 0x320   : > { %v1822_v26 = vpop.permute.xlu0 %1821 }
 0x321   : > { %2012 = vst [vmem:[%s3641_s23 + $0x40] sm:$0xff] %v1987_v14  ;;  %v1852_v42 = vmul.f32 %v1822_v26, %v3836_v51 }
 0x326   : > { %v1912_v33 = vpop.permute.xlu1 %1911 }
 0x327   : > { %v1990_v31 = vadd.f32 %v1912_v33, %v1840_v10 }
 0x329   : > { %2015 = vst [vmem:[%s3641_s23 + $0x58] sm:$0xff] %v1990_v31  ;;  %v1902_v40 = vpop.permute.xlu0 %1901 }
 0x32a   : > { %v1988_v28 = vadd.f32 %v1902_v40, %v1838_v50  ;;  %v1937_v58 = vpop.permute.xlu2 %1936 }
 0x32b   : > { %v1995_v22 = vadd.f32 %v1937_v58, %v1845_v9 }
 0x32c   : > { %2013 = vst [vmem:[%s3641_s23 + $0x48] sm:$0xff] %v1988_v28 }
 0x32d   : > { %2020 = vst [vmem:[%s3641_s23 + $0x80] sm:$0xff] %v1995_v22 }
 0x32e   : > { %v1927_v35 = vpop.permute.xlu1 %1926 }
 0x32f   : > { %v1993_v24 = vadd.f32 %v1927_v35, %v1843_v34 }
 0x331   : > { %2018 = vst [vmem:[%s3641_s23 + $0x70] sm:$0xff] %v1993_v24  ;;  %v1917_v19 = vpop.permute.xlu0 %1916 }
 0x332   : > { %v1991_v13 = vadd.f32 %v1917_v19, %v1841_v7 }
 0x334   : > { %2016 = vst [vmem:[%s3641_s23 + $0x60] sm:$0xff] %v1991_v13 }
 0x33a   : > { %v1952_v2 = vpop.permute.xlu2 %1951 }
 0x33b   : > { %v1998_v44 = vadd.f32 %v1952_v2, %v1848_v4 }
 0x33d   : > { %2023 = vst [vmem:[%s3641_s23 + $0x98] sm:$0xff] %v1998_v44 }
 0x344   : > { %v1942_v45 = vpop.permute.xlu1 %1941 }
 0x345   : > { %v1996_v61 = vadd.f32 %v1942_v45, %v1846_v29 }
 0x347   : > { %2021 = vst [vmem:[%s3641_s23 + $0x88] sm:$0xff] %v1996_v61 }
 0x349   : > { %v1932_v3 = vpop.permute.xlu0 %1931 }
 0x34a   : > { %v1994_v54 = vadd.f32 %v1932_v3, %v1844_v38 }
 0x34c   : > { %2019 = vst [vmem:[%s3641_s23 + $0x78] sm:$0xff] %v1994_v54 }
 0x35c   : > { %v1957_v62 = vpop.permute.xlu1 %1956 }
 0x35d   : > { %v1999_v41 = vadd.f32 %v1957_v62, %v1849_v46 }
 0x35f   : > { %2024 = vst [vmem:[%s3641_s23 + $0xa0] sm:$0xff] %v1999_v41 }
 0x362   : > { %v1947_v55 = vpop.permute.xlu0 %1946 }
 0x363   : > { %v1997_v17 = vadd.f32 %v1947_v55, %v1847_v16 }
 0x365   : > { %2022 = vst [vmem:[%s3641_s23 + $0x90] sm:$0xff] %v1997_v17 }
 0x374   : > { %v1972_v23 = vpop.permute.xlu1 %1971 }
 0x375   : > { %v2002_v20 = vadd.f32 %v1972_v23, %v1852_v42  ;;  %v1967_v27 = vpop.permute.xlu2 %1966 }
 0x376   : > { %v2001_v21 = vadd.f32 %v1967_v27, %v1851_v18 }
 0x377   : > { %2027 = vst [vmem:[%s3641_s23 + $0xb8] sm:$0xff] %v2002_v20 }
 0x378   : > { %2026 = vst [vmem:[%s3641_s23 + $0xb0] sm:$0xff] %v2001_v21 }
 0x37b   : > { %v1962_v53 = vpop.permute.xlu0 %1961 }
 0x37c   : > { %v2000_v1 = vadd.f32 %v1962_v53, %v1850_v49 }
 0x37e   : > { %2025 = vst [vmem:[%s3641_s23 + $0xa8] sm:$0xff] %v2000_v1 }
 0x38b   : > { %v1977_v63 = vpop.permute.xlu0 %1976 }
 0x38c   : > { %v2003_v57 = vadd.f32 %v1977_v63, %v1853_v56 }
 0x38e   : > { %2028 = vst [vmem:[%s3641_s23 + $0xc0] sm:$0xff] %v2003_v57 }
 0x38f   : > { %2412 = shalt.err (!%p2409_p12)
}
 0x390   : > { %s2465_s20 = smov 128   ;;  %s2466_s30 = smov 8  }
 0x391   : > { %2192 = dma.vmem_to_hbm [thread:$0]  (%p2559_p7), %s2043_s21, 3200, %s2045_s7, %s2030_s11, %s2465_s20, %s2465_s20, %s2466_s30  }
 0x392 PF: > { %s2059_s26 = sand.u32 1, %s2443_s15   ;;  %p3840_p13 = scmp.ge.s32.totalorder %s2455_s18, 2 }
 0x393   : > { %s2060_s23 = scalar_lea.sflag [#allocation4], %s2059_s26 }
 0x394   : > { %p2203_p0 = pnand %p3840_p13, %p2527_p6 }
 0x396   : > { %p2204_p3 = pneg %p2203_p0 }
 0x398   : > { %2438 = dma.done.wait (%p2204_p3), %s2060_s23, 3200  }
 0x399   : > { %2440 = vsyncadd (%p2204_p3), %s2060_s23, 4294964096  ;;  %p18_p5 = scmp.ge.s32.totalorder %s2545_s29, 4   ;;  %s3841_s15 = smov %s2447_s16 }
 0x39a   : > { %s3842_s16 = smov %s2451_s17  ;;  %s3843_s17 = smov %s2555_s8 }
 0x39b   : > { %s3844_s18 = smov %s2545_s29  ;;  %20 = sbr.rel (!%p18_p5) target bundleno = 6 (0x6), region = 89 }
 0x3a0   :  { %2066 = vsyncpa [#allocation3], 1 }
 0x3a1   :  { %2068 = vsyncpa [#allocation3 + $0x1], 1 }
 0x3a2   :  { %2069 = vsyncpa [#allocation6], 1 }
 0x3a3   :  { %2071 = vsyncpa [#allocation6 + $0x1], 1 }
 0x3a4   :  { %2072 = vsyncpa [#allocation4], 1 }
 0x3a5   :  { %2074 = vsyncpa [#allocation4 + $0x1], 1 }

</bundles_post_ra>
